<compile_context>
chip_gen: v5e
topology: v5e:2x2
jax: 0.10.0
libtpu: 0.0.40
codegen_flags: <defaults>
</compile_context>

<pallas_src>
import jax
import jax.numpy as jnp
from jax.experimental import pallas as pl
from jax.experimental.pallas import tpu as pltpu


def _make_convd_kernel(c_in, c_out, k, stride, h_out, w_out):
    """Fused conv + bias + LeakyReLU(0.2) as a single MXU matmul per image."""
    hw = h_out * w_out

    def kernel(w_ref, b_ref, x_ref, o_ref):
        # w_ref : (c_out, k*k*c_in)        VMEM  (columns ordered (kh, kw, ci))
        # b_ref : (c_out, 1)               VMEM
        # x_ref : (1, c_in, Hp, Wp)        VMEM  (reflect-padded image)
        # o_ref : (1, c_out, h_out*w_out)  VMEM  (lane-dense output)
        x = x_ref[0]                                       # (c_in, Hp, Wp)

        # im2col: k*k window slices, each covering all Cin planes at once.
        cols = []
        for kh in range(k):
            for kw in range(k):
                if stride == 1:
                    win = x[:, kh:kh + h_out, kw:kw + w_out]
                else:
                    # TODO(synk): replace in-kernel strided slices with a wrapper-side
                    # space-to-depth rearrangement so the kernel conv is always stride-1.
                    win = x[:, kh:kh + stride * (h_out - 1) + 1:stride,
                               kw:kw + stride * (w_out - 1) + 1:stride]
                cols.append(win.reshape(c_in, hw))
        patches = jnp.concatenate(cols, axis=0)            # (k*k*c_in, hw)

        # Single MXU matmul with f32 accumulation: (c_out, K') @ (K', hw) -> (c_out, hw)
        acc = jnp.dot(w_ref[...], patches, preferred_element_type=jnp.float32)
        acc = acc + b_ref[...]                              # bias (broadcast over lanes)
        o_ref[0] = jnp.where(acc >= 0.0, acc, 0.2 * acc).astype(o_ref.dtype)

    return kernel


def convd_forward(x, weight, bias, *, kernel_size, stride, compute_dtype=jnp.float32):
    # compute_dtype=jnp.bfloat16 halves HBM/VMEM traffic and doubles MXU rate on
    # v6e/v7x; keep jnp.float32 on v5e (no bf16 VALU/EUP) and for tight tolerances.
    n, c_in, h, w = x.shape
    c_out = weight.shape[0]
    k = kernel_size
    pad = k // 2

    # ReflectionPad2d(k // 2).
    # TODO(synk): fold the reflect halo into the kernel DMA instead of materializing
    # a full padded copy in HBM (extra read+write of the whole input).
    xpad = jnp.pad(x.astype(compute_dtype),
                   ((0, 0), (0, 0), (pad, pad), (pad, pad)),
                   mode="reflect")
    hp, wp = h + 2 * pad, w + 2 * pad
    h_out = (hp - k) // stride + 1
    w_out = (wp - k) // stride + 1
    hw = h_out * w_out

    # Weights as a lane-contiguous (Cout, k*k*Cin) VMEM tile; column order (kh, kw, ci)
    # matches the in-kernel im2col ordering.  Bias as a (Cout, 1) VMEM column.
    w_mat = jnp.transpose(weight, (0, 2, 3, 1)).reshape(c_out, k * k * c_in)
    w_mat = w_mat.astype(compute_dtype)
    b_col = bias.reshape(c_out, 1).astype(jnp.float32)

    kernel = _make_convd_kernel(c_in, c_out, k, stride, h_out, w_out)

    itemsize = jnp.dtype(compute_dtype).itemsize
    flops = int(2 * n * c_out * c_in * k * k * hw)
    bytes_accessed = int(n * c_in * hp * wp * itemsize      # padded input reads
                         + c_out * k * k * c_in * itemsize  # weights
                         + c_out * 4                        # bias
                         + n * c_out * hw * 4)              # output writes

    # Per-step VMEM working set (double-buffered input/output + resident weights).
    x_block_bytes = c_in * hp * wp * itemsize
    o_block_bytes = c_out * hw * 4
    vmem_needed = 2 * (x_block_bytes + o_block_bytes) + c_out * k * k * c_in * itemsize + c_out * 4
    vmem_limit = int(min(64 * 1024 * 1024, max(2 * vmem_needed, 32 * 1024 * 1024)))

    out_flat = pl.pallas_call(
        kernel,
        out_shape=jax.ShapeDtypeStruct((n, c_out, hw), jnp.float32),
        grid=(n,),
        in_specs=[
            pl.BlockSpec((c_out, k * k * c_in), lambda i: (0, 0)),    # weights (resident)
            pl.BlockSpec((c_out, 1), lambda i: (0, 0)),               # bias
            pl.BlockSpec((1, c_in, hp, wp), lambda i: (i, 0, 0, 0)),  # padded image i
        ],
        out_specs=pl.BlockSpec((1, c_out, hw), lambda i: (i, 0, 0)),
        compiler_params=pltpu.CompilerParams(
            dimension_semantics=("parallel",),
            vmem_limit_bytes=vmem_limit),
        cost_estimate=pl.CostEstimate(flops=flops,
                                      transcendentals=0,
                                      bytes_accessed=bytes_accessed),
    )(w_mat, b_col, xpad)

    return out_flat.reshape(n, c_out, h_out, w_out)


def _convd_ref(x, weight, bias, *, kernel_size, stride):
    # Pure-JAX mirror of the PyTorch module (for verification).
    pad = kernel_size // 2
    xp = jnp.pad(x.astype(jnp.float32),
                 ((0, 0), (0, 0), (pad, pad), (pad, pad)), mode="reflect")
    y = jax.lax.conv_general_dilated(
        xp, weight.astype(jnp.float32),
        window_strides=(stride, stride), padding="VALID",
        dimension_numbers=("NCHW", "OIHW", "NCHW"))
    y = y + bias[None, :, None, None]
    return jnp.where(y >= 0.0, y, 0.2 * y)


if __name__ == "__main__":
    key = jax.random.PRNGKey(0)
    batch, c_in, c_out, k_size, stride_ = 2, 4, 8, 3, 1
    h = w = 16
    k0, k1, k2 = jax.random.split(key, 3)
    x = jax.random.normal(k0, (batch, c_in, h, w), jnp.float32)
    weight = 0.1 * jax.random.normal(k1, (c_out, c_in, k_size, k_size), jnp.float32)
    bias = 0.1 * jax.random.normal(k2, (c_out,), jnp.float32)

    out = jax.block_until_ready(
        convd_forward(x, weight, bias, kernel_size=k_size, stride=stride_))
    ref = jax.block_until_ready(
        _convd_ref(x, weight, bias, kernel_size=k_size, stride=stride_))

    assert out.shape == ref.shape == (batch, c_out, h, w), (out.shape, ref.shape)
    assert out.dtype == jnp.float32
    max_err = float(jnp.max(jnp.abs(out - ref)))
    assert max_err < 1e-4, f"max abs err {max_err}"
    print("KERNEL_OK")
</pallas_src>

<mosaic_0001>
module attributes {stable_mosaic.version = 11 : i64} {
  func.func @kernel(%arg0: i32, %arg1: memref<8x36xf32, #tpu.memory_space<vmem>>, %arg2: memref<8x1xf32, #tpu.memory_space<vmem>>, %arg3: memref<1x4x18x18xf32, #tpu.memory_space<vmem>>, %arg4: memref<1x8x256xf32, #tpu.memory_space<vmem>>) attributes {dimension_semantics = [#tpu.dimension_semantics<parallel>], iteration_bounds = array<i64: 2>, scalar_prefetch = 0 : i64, scratch_operands = 0 : i64, tpu.core_type = #tpu.core_type<tc>, window_params = [{pipeline_mode = #tpu.pipeline_mode<synchronous>, transform_indices = @transform_0, window_bounds = array<i64: 8, 36>}, {pipeline_mode = #tpu.pipeline_mode<synchronous>, transform_indices = @transform_1, window_bounds = array<i64: 8, 1>}, {transform_indices = @transform_2, window_bounds = array<i64: 1, 4, 18, 18>}, {transform_indices = @transform_3, window_bounds = array<i64: 1, 8, 256>}]} {
    %c0 = arith.constant 0 : index
    %c0_0 = arith.constant 0 : index
    %c0_1 = arith.constant 0 : index
    %c0_2 = arith.constant 0 : index
    %0 = vector.load %arg3[%c0, %c0_0, %c0_1, %c0_2] : memref<1x4x18x18xf32, #tpu.memory_space<vmem>>, vector<1x4x18x18xf32>
    %1 = vector.shape_cast %0 : vector<1x4x18x18xf32> to vector<4x18x18xf32>
    %2 = vector.extract_strided_slice %1 {offsets = [0, 0, 0], sizes = [4, 16, 16], strides = [1, 1, 1]} : vector<4x18x18xf32> to vector<4x16x16xf32>
    %3 = vector.shape_cast %2 : vector<4x16x16xf32> to vector<4x256xf32>
    %4 = vector.extract_strided_slice %1 {offsets = [0, 0, 1], sizes = [4, 16, 16], strides = [1, 1, 1]} : vector<4x18x18xf32> to vector<4x16x16xf32>
    %5 = vector.shape_cast %4 : vector<4x16x16xf32> to vector<4x256xf32>
    %6 = vector.extract_strided_slice %1 {offsets = [0, 0, 2], sizes = [4, 16, 16], strides = [1, 1, 1]} : vector<4x18x18xf32> to vector<4x16x16xf32>
    %7 = vector.shape_cast %6 : vector<4x16x16xf32> to vector<4x256xf32>
    %8 = vector.extract_strided_slice %1 {offsets = [0, 1, 0], sizes = [4, 16, 16], strides = [1, 1, 1]} : vector<4x18x18xf32> to vector<4x16x16xf32>
    %9 = vector.shape_cast %8 : vector<4x16x16xf32> to vector<4x256xf32>
    %10 = vector.extract_strided_slice %1 {offsets = [0, 1, 1], sizes = [4, 16, 16], strides = [1, 1, 1]} : vector<4x18x18xf32> to vector<4x16x16xf32>
    %11 = vector.shape_cast %10 : vector<4x16x16xf32> to vector<4x256xf32>
    %12 = vector.extract_strided_slice %1 {offsets = [0, 1, 2], sizes = [4, 16, 16], strides = [1, 1, 1]} : vector<4x18x18xf32> to vector<4x16x16xf32>
    %13 = vector.shape_cast %12 : vector<4x16x16xf32> to vector<4x256xf32>
    %14 = vector.extract_strided_slice %1 {offsets = [0, 2, 0], sizes = [4, 16, 16], strides = [1, 1, 1]} : vector<4x18x18xf32> to vector<4x16x16xf32>
    %15 = vector.shape_cast %14 : vector<4x16x16xf32> to vector<4x256xf32>
    %16 = vector.extract_strided_slice %1 {offsets = [0, 2, 1], sizes = [4, 16, 16], strides = [1, 1, 1]} : vector<4x18x18xf32> to vector<4x16x16xf32>
    %17 = vector.shape_cast %16 : vector<4x16x16xf32> to vector<4x256xf32>
    %18 = vector.extract_strided_slice %1 {offsets = [0, 2, 2], sizes = [4, 16, 16], strides = [1, 1, 1]} : vector<4x18x18xf32> to vector<4x16x16xf32>
    %19 = vector.shape_cast %18 : vector<4x16x16xf32> to vector<4x256xf32>
    %20 = tpu.concatenate %3, %5, %7, %9, %11, %13, %15, %17, %19 in 0 : vector<4x256xf32>, vector<4x256xf32>, vector<4x256xf32>, vector<4x256xf32>, vector<4x256xf32>, vector<4x256xf32>, vector<4x256xf32>, vector<4x256xf32>, vector<4x256xf32> -> vector<36x256xf32>
    %c0_3 = arith.constant 0 : index
    %c0_4 = arith.constant 0 : index
    %21 = vector.load %arg1[%c0_3, %c0_4] : memref<8x36xf32, #tpu.memory_space<vmem>>, vector<8x36xf32>
    %cst = arith.constant dense<0.000000e+00> : vector<8x256xf32>
    %22 = tpu.matmul %21, %20, %cst {dimension_numbers = #tpu.dot_dimension_numbers<[1], [0], [0], [1], [0, 0, 1, 1], [], []>} : vector<8x36xf32>, vector<36x256xf32>, vector<8x256xf32> -> vector<8x256xf32>
    %c0_5 = arith.constant 0 : index
    %c0_6 = arith.constant 0 : index
    %23 = vector.load %arg2[%c0_5, %c0_6] : memref<8x1xf32, #tpu.memory_space<vmem>>, vector<8x1xf32>
    %24 = vector.broadcast %23 : vector<8x1xf32> to vector<8x256xf32>
    %25 = arith.addf %22, %24 : vector<8x256xf32>
    %cst_7 = arith.constant 0.000000e+00 : f32
    %26 = vector.broadcast %cst_7 : f32 to vector<8x256xf32>
    %27 = arith.cmpf oge, %25, %26 : vector<8x256xf32>
    %cst_8 = arith.constant 2.000000e-01 : f32
    %28 = vector.broadcast %cst_8 : f32 to vector<8x256xf32>
    %29 = arith.mulf %28, %25 : vector<8x256xf32>
    %30 = arith.select %27, %25, %29 : vector<8x256xi1>, vector<8x256xf32>
    %c0_9 = arith.constant 0 : index
    %c0_10 = arith.constant 0 : index
    %c0_11 = arith.constant 0 : index
    %31 = vector.load %arg4[%c0_9, %c0_10, %c0_11] : memref<1x8x256xf32, #tpu.memory_space<vmem>>, vector<1x8x256xf32>
    %32 = vector.shape_cast %31 : vector<1x8x256xf32> to vector<8x256xf32>
    %33 = vector.shape_cast %30 : vector<8x256xf32> to vector<1x8x256xf32>
    tpu.vector_store %arg4[%c0_9, %c0_10, %c0_11], %33 {strides = array<i32>} : memref<1x8x256xf32, #tpu.memory_space<vmem>>, vector<1x8x256xf32>,
    return
  }
  func.func @transform_0(%arg0: i32) -> (i32, i32) {
    %c0_i32 = arith.constant 0 : i32
    %c0_i32_0 = arith.constant 0 : i32
    %c0_i32_1 = arith.constant 0 : i32
    return %c0_i32, %c0_i32_0 : i32, i32
  }
  func.func @transform_1(%arg0: i32) -> (i32, i32) {
    %c0_i32 = arith.constant 0 : i32
    %c0_i32_0 = arith.constant 0 : i32
    %c0_i32_1 = arith.constant 0 : i32
    return %c0_i32, %c0_i32_0 : i32, i32
  }
  func.func @transform_2(%arg0: i32) -> (i32, i32, i32, i32) {
    %c0_i32 = arith.constant 0 : i32
    %c0_i32_0 = arith.constant 0 : i32
    %c0_i32_1 = arith.constant 0 : i32
    %c0_i32_2 = arith.constant 0 : i32
    return %arg0, %c0_i32, %c0_i32_0, %c0_i32_1 : i32, i32, i32, i32
  }
  func.func @transform_3(%arg0: i32) -> (i32, i32, i32) {
    %c0_i32 = arith.constant 0 : i32
    %c0_i32_0 = arith.constant 0 : i32
    %c0_i32_1 = arith.constant 0 : i32
    return %arg0, %c0_i32, %c0_i32_0 : i32, i32, i32
  }
}

</mosaic_0001>

<bundles_post_ra>
// kernel: tpu_custom_call.1
= control target key start
LH: loop header
LB: loop body
LE: loop exit
PB: predicated region body
PF: predicated region fallthrough
CT: control target
= control target key end

     0   :  { %8 = vsyncpa [#allocation3], 0  ;;  %s4282_s0 = inlined_call_operand.vmem [shape: f32[8,36], index: 0, kind: input, shape index: {}]   ;;  %s4283_s1 = inlined_call_operand.vmem [shape: f32[8,1], index: 1, kind: input, shape index: {}]   ;;  %s4284_s2 = inlined_call_operand.vmem [shape: f32[2,4,18,18], index: 2, kind: input, shape index: {}]   ;;  %s4285_s3 = inlined_call_operand.hbm [shape: f32[2,8,256], index: 3, kind: output, shape index: {}]  }
   0x1   :  { %10 = vsyncpa [#allocation3 + $0x1], 0  ;;  %s2764_s12 = smov 0   ;;  %s2766_s13 = smov 0  }
   0x2   :  { %s2768_s14 = smov 0   ;;  %s2770_s15 = smov 0  }
   0x3 LB: > { %s2785_s16 = sadd.s32 4294967295, %s2730_s15   ;;  %s2215_s17 = sadd.s32 4294967294, %s2730_s15   ;;  %s2730_s15 = sphi %s2770_s15, %s4318_s15   ;;  %s2726_s14 = sphi %s2768_s14, %s4317_s14   ;;  %s2722_s13 = sphi %s2766_s13, %s4316_s13   ;;  %s2718_s12 = sphi %s2764_s12, %s4315_s12  }
   0x4   : > { %s2789_s18 = sadd.s32 1, %s2730_s15   ;;  %s91_s19 = sadd.s32 1, %s2726_s14 }
   0x5   : > { %s88_s20 = ssub.s32 %s2730_s15, %s2789_s18  ;;  %p101_p0 = scmp.ne.s32.totalorder %s2726_s14, %s2722_s13 }
   0x6   : > { %p89_p1 = scmp.eq.s32.totalorder %s88_s20, 0  ;;  %p102_p2 = scmp.eq.s32.totalorder %s2785_s16, 1 }
   0x7   : > { %p107_p3 = scmp.ne.s32.totalorder %s2722_s13, %s2718_s12  ;;  %p108_p4 = scmp.eq.s32.totalorder %s2215_s17, 1 }
   0x8   : > { %s2800_s21 = scalar_select %p89_p1, %s2726_s14, %s91_s19  }
   0x9   : > { %p2802_p5 = por %p102_p2, %p101_p0  ;;  %p2806_p6 = por %p108_p4, %p107_p3 }
   0xa   : > { %p2218_p7 = scmp.ge.s32.totalorder %s2730_s15, 1  ;;  %p140_p8 = scmp.lt.s32.totalorder %s2730_s15, 3 }
   0xc   : > { %p141_p9 = pnand %p2218_p7, %p140_p8 }
   0xe   : > { %144 = sbr.rel (%p141_p9) target bundleno = 758 (0x2f6), region = 32 }
  0x13   : > { %p164_p10 = scmp.lt.s32.totalorder %s2785_s16, 1  ;;  %v2732_v0 = vmov 1983009808   ;;  %vm182_vm0 = vcmask 1047556   ;;  %v2733_v11 = vmov 1934713408  }
  0x14   : > { %v187_v1 = vunpack.c.l.s4 %v2732_v0  ;;  %v211_v12 = vunpack.c.l.s4 %v2733_v11  ;;  %s2734_s29 = smov 127   ;;  %s2735_s30 = smov 64   ;;  %vm795_vm1 = vcmask 1046528   ;;  %vm1418_vm2 = vcmask 1045504  }
  0x15   : > { %s165_s24 = scalar_select %p164_p10, %s2785_s16, 1  ;;  %vm350_vm3 = vcmask 130048   ;;  %vm352_vm4 = vcmask 261120   ;;  %vm354_vm5 = vcmask 392192   ;;  %vm356_vm6 = vcmask 523264  }
  0x16   : > { %v2842_v10 = vunpack.c.0.s8 %v187_v1  ;;  %v2873_v31 = vunpack.c.0.s8 %v211_v12  ;;  %s2736_s4 = smov 32   ;;  %s2737_s5 = smov 48   ;;  %vm358_vm7 = vcmask 654336   ;;  %vm360_vm8 = vcmask 785408  }
  0x17   : > { %s2231_s25 = smul.u32 96, %s165_s24  ;;  %s2738_s6 = smov 16   ;;  %vm362_vm9 = vcmask 916480   ;;  %vm2065_vm10 = vcmask 1043456   ;;  %vm2081_vm11 = vcmask 293888  }
  0x18   : > { %s2739_s7 = smov 96   ;;  %s2740_s8 = smov 112  }
  0x19   : > { %s2817_s28 = scalar_lea.vmem %s4284_s2, %s2231_s25  ;;  %s2741_s9 = smov 80  }
  0x1a   : > { %v2820_v2 = vld [vmem:[%s2817_s28] sm:$0xff]  ;;  %v2823_v3 = vld [vmem:[%s2817_s28 + $0x8] sm:$0xff]  ;;  %v2826_v4 = vld [vmem:[%s2817_s28 + $0x18] sm:$0xff]  ;;  %s2742_s10 = smov 126   ;;  %s161_s24 = sand.u32 1, %s2722_s13  }
  0x1b   : > { %v2830_v5 = vpack.i.bf16 %v2823_v3, %v2820_v2  ;;  %v2833_v6 = vld [vmem:[%s2817_s28 + $0x20] sm:$0xff]  ;;  %v2836_v7 = vld [vmem:[%s2817_s28 + $0x30] sm:$0xff]  ;;  %v2839_v8 = vld [vmem:[%s2817_s28 + $0x38] sm:$0xff]  ;;  %v184_v9 = vrot.slane %v2820_v2, 4  ;;  %v196_v15 = vrot.slane %v2826_v4, 4  ;;  %v240_v16 = vrot.slane %v2823_v3, 4 }
  0x1c   : > { %v2845_v13 = vld [vmem:[%s2817_s28 + $0x48] sm:$0xff]  ;;  %v2848_v14 = vld [vmem:[%s2817_s28 + $0x50] sm:$0xff]  ;;  %v252_v17 = vrot.slane %v2833_v6, 4  ;;  %v181_v18 = vrot.slane %v2836_v7, 4  ;;  %v238_v21 = vrot.slane %v2839_v8, 4  ;;  %s2219_s25 = sshll.u32 %s161_s24, 4 }
  0x1d   : > { %2284 = vrot.lane.b32.xlu1 %v2830_v5, %s2734_s29  ;;  %v185_v19 = vsel %vm182_vm0, %v2836_v7, %v184_v9  ;;  %v194_v20 = vrot.slane %v2845_v13, 4  ;;  %v250_v22 = vrot.slane %v2848_v14, 4  ;;  %v197_v24 = vsel %vm182_vm0, %v2845_v13, %v196_v15  ;;  %s2230_s26 = sshll.u32 %s2785_s16, 4  ;;  %s2140_s16 = scalar_lea.sflag [#allocation3], %s161_s24 }
  0x1e   : > { %v193_v23 = vperm.slane %v185_v19, %v2842_v10  ;;  %v241_v25 = vsel %vm182_vm0, %v2839_v8, %v240_v16  ;;  %v253_v26 = vsel %vm182_vm0, %v2848_v14, %v252_v17  ;;  %v205_v27 = vperm.slane %v197_v24, %v2842_v10 }
  0x1f   : > { %v249_v28 = vperm.slane %v241_v25, %v2842_v10  ;;  %v261_v29 = vperm.slane %v253_v26, %v2842_v10  ;;  %v183_v30 = vsel %vm182_vm0, %v181_v18, %v2820_v2  ;;  %v195_v33 = vsel %vm182_vm0, %v194_v20, %v2826_v4  ;;  %v171_v20 = vld [vmem:[%s2817_s28 + $0x10] sm:$0x3] }
  0x20   : > { %v189_v32 = vperm.slane %v183_v30, %v2842_v10  ;;  %v239_v34 = vsel %vm182_vm0, %v238_v21, %v2823_v3  ;;  %v218_v35 = vrot.slane %v205_v27, 4  ;;  %v220_v36 = vrot.slane %v193_v23, 4 }
  0x21   : > { %v274_v37 = vrot.slane %v261_v29, 4  ;;  %v201_v38 = vperm.slane %v195_v33, %v2842_v10  ;;  %v276_v39 = vrot.slane %v249_v28, 4  ;;  %v245_v41 = vperm.slane %v239_v34, %v2842_v10  ;;  %v2935_v33 = vld [vmem:[%s2817_s28 + $0x40] sm:$0x3] }
  0x22   : > { %v208_v40 = vrot.slane %v189_v32, 4  ;;  %v251_v42 = vsel %vm182_vm0, %v250_v22, %v2833_v6  ;;  %v219_v43 = vsel %vm182_vm0, %v218_v35, %v193_v23  ;;  %v221_v54 = vsel %vm182_vm0, %v205_v27, %v220_v36 }
  0x23   : > { %v275_v44 = vsel %vm182_vm0, %v274_v37, %v249_v28  ;;  %v206_v45 = vrot.slane %v201_v38, 4  ;;  %v257_v46 = vperm.slane %v251_v42, %v2842_v10  ;;  %v225_v47 = vperm.slane %v219_v43, %v2873_v31  ;;  %v2930_v28 = vld [vmem:[%s2817_s28 + $0x28] sm:$0x3] }
  0x24   : > { %v2889_v48 = vperm.slane %v275_v44, %v2873_v31  ;;  %v209_v49 = vsel %vm182_vm0, %v201_v38, %v208_v40  ;;  %v264_v50 = vrot.slane %v245_v41, 4  ;;  %v229_v58 = vperm.slane %v221_v54, %v2873_v31 }
  0x25   : > { %v217_v51 = vperm.slane %v209_v49, %v2873_v31  ;;  %v262_v52 = vrot.slane %v257_v46, 4  ;;  %v207_v53 = vsel %vm182_vm0, %v206_v45, %v189_v32  ;;  %v277_v62 = vsel %vm182_vm0, %v261_v29, %v276_v39 }
  0x26   : > { %v2298_v55 = vpack.i.bf16 %v2889_v48, %v225_v47  ;;  %v265_v56 = vsel %vm182_vm0, %v257_v46, %v264_v50  ;;  %v2898_v57 = vperm.slane %v207_v53, %v2873_v31  ;;  %v285_v1 = vperm.slane %v277_v62, %v2873_v31 }
  0x27   : > { %v273_v59 = vperm.slane %v265_v56, %v2873_v31  ;;  %v232_v60 = vrot.slane %v217_v51, 4  ;;  %v263_v61 = vsel %vm182_vm0, %v262_v52, %v245_v41  ;;  %v2913_v15 = vpack.i.bf16 %v2833_v6, %v2826_v4 }
  0x28   : > { %2299 = vrot.lane.b32.xlu1 %v2298_v55, %s2735_s30  ;;  %v230_v63 = vrot.slane %v2898_v57, 4  ;;  %v2907_v0 = vperm.slane %v263_v61, %v2873_v31  ;;  %v236_v17 = vrot.slane %v229_v58, 4  ;;  %v292_v18 = vrot.slane %v285_v1, 4 }
  0x29   : > { %v288_v9 = vrot.slane %v273_v59, 4  ;;  %v2293_v11 = vpack.i.bf16 %v273_v59, %v217_v51  ;;  %v233_v12 = vsel %vm182_vm0, 0.0, %v232_v60  ;;  %2289 = vrot.lane.b32.xlu2 %v2913_v15, %s2734_s29  ;;  %v234_v24 = vrot.slane %v225_v47, 4 }
  0x2a   : > { %v286_v16 = vrot.slane %v2907_v0, 4  ;;  %v231_v22 = vsel %vm182_vm0, 0.0, %v230_v63  ;;  %v797_v25 = vrot.slane %v2823_v3, 1  ;;  %v796_v26 = vrot.slane %v2820_v2, 1  ;;  %v2939_v3 = vld [vmem:[%s2817_s28 + $0x58] sm:$0x3] }
  0x2b   : > { %2294 = vrot.lane.b32.xlu0 %v2293_v11, %s2736_s4  ;;  %v289_v19 = vsel %vm182_vm0, 0.0, %v288_v9  ;;  %v2927_v27 = vpack.i.bf16 %v2848_v14, %v2845_v13  ;;  %v237_v29 = vsel %vm182_vm0, 0.0, %v236_v17  ;;  %v293_v30 = vsel %vm182_vm0, 0.0, %v292_v18 }
  0x2c   : > { %v2313_v21 = vpack.i.bf16 %v289_v19, %v233_v12  ;;  %v287_v23 = vsel %vm182_vm0, 0.0, %v286_v16  ;;  %v2303_v32 = vpack.i.bf16 %v285_v1, %v229_v58  ;;  %v799_v34 = vrot.slane %v171_v20, 1 }
  0x2d   : > { %v2308_v35 = vpack.i.bf16 %v287_v23, %v231_v22  ;;  %v290_v36 = vrot.slane %v2889_v48, 4  ;;  %v801_v2 = vrot.slane %v2826_v4, 1  ;;  %v802_v37 = vrot.slane %v2833_v6, 1 }
  0x2e   : > { %v235_v38 = vsel %vm182_vm0, 0.0, %v234_v24  ;;  %v804_v39 = vrot.slane %v2930_v28, 1  ;;  %v806_v40 = vrot.slane %v2836_v7, 1  ;;  %v2948_v41 = vsel %vm795_vm1, %v796_v26, %v797_v25 }
  0x2f   : > { %v807_v42 = vrot.slane %v2839_v8, 1  ;;  %v809_v43 = vrot.slane %v2935_v33, 1  ;;  %v811_v44 = vrot.slane %v2845_v13, 1  ;;  %v2954_v45 = vsel %vm795_vm1, %v797_v25, %v799_v34 }
  0x30   : > { %2314 = vrot.lane.b32.xlu1 %v2313_v21, %s2737_s5  ;;  %v2957_v46 = vsel %vm795_vm1, %v801_v2, %v802_v37  ;;  %v812_v47 = vrot.slane %v2848_v14, 1  ;;  %v814_v48 = vrot.slane %v2939_v3, 1  ;;  %v291_v49 = vsel %vm182_vm0, 0.0, %v290_v36 }
  0x31   : > { %2304 = vrot.lane.b32.xlu2 %v2303_v32, %s2739_s7  ;;  %v2965_v50 = vsel %vm795_vm1, %v802_v37, %v804_v39  ;;  %v2968_v51 = vsel %vm795_vm1, %v806_v40, %v807_v42  ;;  %v2971_v52 = vsel %vm795_vm1, %v807_v42, %v809_v43  ;;  %v2323_v60 = vpack.i.bf16 %v293_v30, %v237_v29 }
  0x32   : > { %v2974_v53 = vsel %vm795_vm1, %v811_v44, %v812_v47  ;;  %v2977_v54 = vsel %vm795_vm1, %v812_v47, %v814_v48  ;;  %v824_v55 = vrot.slane %v2968_v51, 4  ;;  %v880_v56 = vrot.slane %v2971_v52, 4 }
  0x33   : > { %2309 = vrot.lane.b32.xlu0 %v2308_v35, %s2738_s6  ;;  %v836_v58 = vrot.slane %v2974_v53, 4  ;;  %v892_v59 = vrot.slane %v2977_v54, 4  ;;  %v2318_v61 = vpack.i.bf16 %v291_v49, %v235_v38  ;;  %v826_v18 = vrot.slane %v2948_v41, 4 }
  0x34   : > { %v825_v62 = vsel %vm182_vm0, %v824_v55, %v2948_v41  ;;  %v881_v63 = vsel %vm182_vm0, %v880_v56, %v2954_v45  ;;  %v838_v19 = vrot.slane %v2957_v46, 4  ;;  %v882_v22 = vrot.slane %v2954_v45, 4 }
  0x35   : > { %v831_v1 = vperm.slane %v825_v62, %v2842_v10  ;;  %v837_v9 = vsel %vm182_vm0, %v836_v58, %v2957_v46  ;;  %v887_v11 = vperm.slane %v881_v63, %v2842_v10  ;;  %v893_v12 = vsel %vm182_vm0, %v892_v59, %v2965_v50 }
  0x36   : > { %v843_v16 = vperm.slane %v837_v9, %v2842_v10  ;;  %v899_v17 = vperm.slane %v893_v12, %v2842_v10  ;;  %v894_v24 = vrot.slane %v2965_v50, 4  ;;  %v827_v30 = vsel %vm182_vm0, %v2968_v51, %v826_v18 }
  0x37   : > { %v850_v20 = vrot.slane %v831_v1, 4  ;;  %v906_v21 = vrot.slane %v887_v11, 4  ;;  %v883_v32 = vsel %vm182_vm0, %v2971_v52, %v882_v22  ;;  %v2328_v34 = vpack.i.bf16 %v2839_v8, %v2836_v7 }
  0x38   : > { %2334 = vrot.lane.b32.xlu1 %v2927_v27, %s2734_s29  ;;  %v839_v35 = vsel %vm182_vm0, %v2974_v53, %v838_v19  ;;  %v848_v36 = vrot.slane %v843_v16, 4  ;;  %v904_v2 = vrot.slane %v899_v17, 4  ;;  %v835_v39 = vperm.slane %v827_v30, %v2842_v10 }
  0x39   : > { %2319 = vrot.lane.b32.xlu2 %v2318_v61, %s2741_s9  ;;  %v851_v23 = vsel %vm182_vm0, %v843_v16, %v850_v20  ;;  %v907_v25 = vsel %vm182_vm0, %v899_v17, %v906_v21  ;;  %v891_v40 = vperm.slane %v883_v32, %v2842_v10  ;;  %v895_v42 = vsel %vm182_vm0, %v2977_v54, %v894_v24 }
  0x3a   : > { %v859_v26 = vperm.slane %v851_v23, %v2873_v31  ;;  %v915_v29 = vperm.slane %v907_v25, %v2873_v31  ;;  %v862_v47 = vrot.slane %v835_v39, 4  ;;  %v847_v49 = vperm.slane %v839_v35, %v2842_v10 }
  0x3b   : > { %2324 = vrot.lane.b32.xlu0 %v2323_v60, %s2740_s8  ;;  %v918_v48 = vrot.slane %v891_v40, 4  ;;  %v903_v55 = vperm.slane %v895_v42, %v2842_v10  ;;  %v849_v56 = vsel %vm182_vm0, %v848_v36, %v831_v1  ;;  %v905_v58 = vsel %vm182_vm0, %v904_v2, %v887_v11 }
  0x3c   : > { %v874_v37 = vrot.slane %v859_v26, 4  ;;  %v930_v38 = vrot.slane %v915_v29, 4  ;;  %v3033_v59 = vperm.slane %v905_v58, %v2873_v31  ;;  %v863_v61 = vsel %vm182_vm0, %v847_v49, %v862_v47 }
  0x3d   : > { %v919_v62 = vsel %vm182_vm0, %v903_v55, %v918_v48  ;;  %v860_v9 = vrot.slane %v847_v49, 4  ;;  %v916_v11 = vrot.slane %v903_v55, 4  ;;  %v871_v17 = vperm.slane %v863_v61, %v2873_v31 }
  0x3e   : > { %v875_v43 = vsel %vm182_vm0, 0.0, %v874_v37  ;;  %v931_v44 = vsel %vm182_vm0, 0.0, %v930_v38  ;;  %v928_v1 = vrot.slane %v3033_v59, 4  ;;  %v927_v18 = vperm.slane %v919_v62, %v2873_v31 }
  0x3f   : > { %v2368_v60 = vpack.i.bf16 %v931_v44, %v875_v43  ;;  %v861_v20 = vsel %vm182_vm0, %v860_v9, %v835_v39  ;;  %v917_v21 = vsel %vm182_vm0, %v916_v11, %v891_v40  ;;  %v878_v30 = vrot.slane %v871_v17, 4 }
  0x40   : > { %2344 = vrot.lane.b32.xlu1 %v2913_v15, %s2742_s10  ;;  %v3030_v15 = vperm.slane %v849_v56, %v2873_v31  ;;  %v929_v16 = vsel %vm182_vm0, 0.0, %v928_v1  ;;  %v2383_v22 = vpack.i.bf16 %v927_v18, %v871_v17  ;;  %v867_v23 = vperm.slane %v861_v20, %v2873_v31 }
  0x41   : > { %2349 = vrot.lane.b32.xlu2 %v2328_v34, %s2742_s10  ;;  %v923_v24 = vperm.slane %v917_v21, %v2873_v31  ;;  %v934_v32 = vrot.slane %v927_v18, 4  ;;  %v2363_v36 = vpack.i.bf16 %v915_v29, %v859_v26  ;;  %v3069_v39 = vpack.i.bf16 %v2971_v52, %v2968_v51 }
  0x42   : > { %v872_v63 = vrot.slane %v3030_v15, 4  ;;  %v876_v37 = vrot.slane %v867_v23, 4  ;;  %v2393_v26 = vpack.i.bf16 %v2954_v45, %v2948_v41  ;;  %v2408_v29 = vpack.i.bf16 %v2977_v54, %v2974_v53 }
  0x43   : > { %2329 = vrot.lane.b32.xlu0 %v2328_v34, %s2734_s29  ;;  %v2373_v25 = vpack.i.bf16 %v923_v24, %v867_v23  ;;  %v879_v34 = vsel %vm182_vm0, 0.0, %v878_v30  ;;  %v935_v35 = vsel %vm182_vm0, 0.0, %v934_v32  ;;  %v932_v38 = vrot.slane %v923_v24, 4 }
  0x44   : > { %v873_v12 = vsel %vm182_vm0, 0.0, %v872_v63  ;;  %v2388_v2 = vpack.i.bf16 %v935_v35, %v879_v34  ;;  %v1435_v51 = vrot.slane %v2848_v14, 2  ;;  %v1437_v52 = vrot.slane %v2939_v3, 2 }
  0x45   : > { %v2358_v19 = vpack.i.bf16 %v929_v16, %v873_v12  ;;  %v1434_v41 = vrot.slane %v2845_v13, 2  ;;  %v1425_v54 = vrot.slane %v2833_v6, 2  ;;  %v1427_v14 = vrot.slane %v2930_v28, 2 }
  0x46   : > { %v3086_v42 = vsel %vm1418_vm2, %v1435_v51, %v1437_v52  ;;  %v1424_v3 = vrot.slane %v2826_v4, 2  ;;  %v1429_v43 = vrot.slane %v2836_v7, 2  ;;  %v1430_v44 = vrot.slane %v2839_v8, 2 }
  0x47   : > { %v3094_v53 = vsel %vm1418_vm2, %v1434_v41, %v1435_v51  ;;  %v1432_v47 = vrot.slane %v2935_v33, 2  ;;  %v3109_v6 = vsel %vm1418_vm2, %v1425_v54, %v1427_v14 }
  0x48   : > { %2369 = vrot.lane.b32.xlu1 %v2368_v60, %s2737_s5  ;;  %v2418_v13 = vpack.i.bf16 %v3086_v42, %v3094_v53  ;;  %v3112_v28 = vsel %vm1418_vm2, %v1424_v3, %v1425_v54  ;;  %v3116_v4 = vsel %vm1418_vm2, %v1429_v43, %v1430_v44 }
  0x49   : > { %2359 = vrot.lane.b32.xlu2 %v2358_v19, %s2738_s6  ;;  %v3119_v49 = vsel %vm1418_vm2, %v1430_v44, %v1432_v47  ;;  %v2428_v7 = vpack.i.bf16 %v3109_v6, %v3112_v28 }
  0x4a   : > { %v2433_v8 = vpack.i.bf16 %v3119_v49, %v3116_v4 }
  0x4b   : > { %2339 = vrot.lane.b32.xlu0 %v2830_v5, %s2742_s10  ;;  %v3057_v5 = vpack.i.bf16 %v2965_v50, %v2957_v46  ;;  %v933_v46 = vsel %vm182_vm0, 0.0, %v932_v38 }
  0x50   : > { %2384 = vrot.lane.b32.xlu1 %v2383_v22, %s2739_s7 }
  0x51   : > { %2374 = vrot.lane.b32.xlu2 %v2373_v25, %s2735_s30 }
  0x53   : > { %2354 = vrot.lane.b32.xlu0 %v2927_v27, %s2742_s10  ;;  %v877_v27 = vsel %vm182_vm0, 0.0, %v876_v37 }
  0x54   : > { %v2378_v50 = vpack.i.bf16 %v933_v46, %v877_v27 }
  0x58   : > { %2399 = vrot.lane.b32.xlu1 %v3057_v5, %s2734_s29 }
  0x59   : > { %2389 = vrot.lane.b32.xlu2 %v2388_v2, %s2740_s8 }
  0x5b   : > { %2364 = vrot.lane.b32.xlu0 %v2363_v36, %s2736_s4 }
  0x60   : > { %1847 = vrot.lane.b32.xlu1 %v3094_v53, %s2742_s10 }
  0x61   : > { %2404 = vrot.lane.b32.xlu2 %v3069_v39, %s2734_s29 }
  0x63   : > { %2379 = vrot.lane.b32.xlu0 %v2378_v50, %s2741_s9 }
  0x68   : > { %2429 = vrot.lane.b32.xlu1 %v2428_v7, %s2734_s29 }
  0x69   : > { %2414 = vrot.lane.b32.xlu2 %v2393_v26, %s2742_s10 }
  0x6b   : > { %2394 = vrot.lane.b32.xlu0 %v2393_v26, %s2734_s29 }
  0x71   : > { %1849 = vrot.lane.b32.xlu2 %v3086_v42, %s2742_s10 }
  0x73   : > { %2409 = vrot.lane.b32.xlu0 %v2408_v29, %s2734_s29 }
  0x79   : > { %2434 = vrot.lane.b32.xlu2 %v2433_v8, %s2734_s29 }
  0x7b   : > { %2419 = vrot.lane.b32.xlu0 %v2418_v13, %s2734_s29 }
  0x83   : > { %v3081_v40 = vpop.permute.xlu2 %2289  ;;  %2424 = vrot.lane.b32.xlu0 %v2408_v29, %s2742_s10 }
  0x84   : > { %v2292_v60 = vunpack.i.h.bf16 %v3081_v40  ;;  %v2291_v34 = vunpack.i.l.bf16 %v3081_v40 }
  0x86   : > { %v473_v36 = vrot.slane %v2292_v60, 4  ;;  %v417_v50 = vrot.slane %v2291_v34, 4 }
  0x8b   : > { %v3106_v48 = vpop.permute.xlu2 %2304 }
  0x8c   : > { %v2307_v41 = vunpack.i.h.bf16 %v3106_v48  ;;  %v2306_v54 = vunpack.i.l.bf16 %v3106_v48 }
  0x8f   : > { %v3089_v45 = vpop.permute.xlu1 %2284 }
  0x90   : > { %v2287_v27 = vunpack.i.h.bf16 %v3089_v45  ;;  %v2286_v46 = vunpack.i.l.bf16 %v3089_v45 }
  0x92   : > { %v461_v3 = vrot.slane %v2287_v27, 4  ;;  %v405_v45 = vrot.slane %v2286_v46, 4 }
  0x93   : > { %v2320_v56 = vpop.permute.xlu2 %2319 }
  0x94   : > { %v2322_v21 = vunpack.i.h.bf16 %v2320_v56  ;;  %v2321_v22 = vunpack.i.l.bf16 %v2320_v56 }
  0x9a   : > { %v2300_v33 = vpop.permute.xlu1 %2299 }
  0x9b   : > { %v2302_v11 = vunpack.i.h.bf16 %v2300_v33  ;;  %v2301_v12 = vunpack.i.l.bf16 %v2300_v33  ;;  %v3129_v18 = vpop.permute.xlu2 %2349 }
  0x9c   : > { %v2352_v51 = vunpack.i.h.bf16 %v3129_v18  ;;  %v2351_v52 = vunpack.i.l.bf16 %v3129_v18 }
  0x9d   : > { %v2295_v55 = vpop.permute.xlu0 %2294 }
  0x9e   : > { %v2297_v16 = vunpack.i.h.bf16 %v2295_v55  ;;  %v2296_v17 = vunpack.i.l.bf16 %v2295_v55  ;;  %v665_v8 = vrot.slane %v2352_v51, 4  ;;  %v609_v48 = vrot.slane %v2351_v52, 4 }
  0xa2   : > { %v2315_v58 = vpop.permute.xlu1 %2314 }
  0xa3   : > { %v2317_v62 = vunpack.i.h.bf16 %v2315_v58  ;;  %v2316_v63 = vunpack.i.l.bf16 %v2315_v58  ;;  %v3151_v14 = vpop.permute.xlu2 %2359 }
  0xa4   : > { %v2362_v13 = vunpack.i.h.bf16 %v3151_v14  ;;  %v2361_v33 = vunpack.i.l.bf16 %v3151_v14 }
  0xa5   : > { %v2310_v61 = vpop.permute.xlu0 %2309 }
  0xa6   : > { %v2312_v1 = vunpack.i.h.bf16 %v2310_v61  ;;  %v2311_v9 = vunpack.i.l.bf16 %v2310_v61 }
  0xa8   : > { %v364_v19 = vsel %vm350_vm3, %v2907_v0, %v2312_v1  ;;  %v351_v20 = vsel %vm350_vm3, %v2898_v57, %v2311_v9 }
  0xa9   : > { %v365_v23 = vsel %vm352_vm4, %v364_v19, %v2297_v16  ;;  %v353_v24 = vsel %vm352_vm4, %v351_v20, %v2296_v17 }
  0xaa   : > { %v355_v25 = vsel %vm354_vm5, %v353_v24, %v2316_v63  ;;  %v366_v30 = vsel %vm354_vm5, %v365_v23, %v2317_v62  ;;  %v2335_v32 = vpop.permute.xlu1 %2334 }
  0xab   : > { %v357_v35 = vsel %vm356_vm6, %v355_v25, %v2301_v12  ;;  %v367_v0 = vsel %vm356_vm6, %v366_v30, %v2302_v11  ;;  %v2337_v37 = vunpack.i.h.bf16 %v2335_v32  ;;  %v2336_v26 = vunpack.i.l.bf16 %v2335_v32 }
  0xac   : > { %v359_v57 = vsel %vm358_vm7, %v357_v35, %v2321_v22  ;;  %v368_v2 = vsel %vm358_vm7, %v367_v0, %v2322_v21 }
  0xad   : > { %v2325_v38 = vpop.permute.xlu0 %2324  ;;  %v471_v29 = vrot.slane %v2337_v37, 4  ;;  %v474_v40 = vsel %vm182_vm0, %v2337_v37, %v473_v36  ;;  %v415_v44 = vrot.slane %v2336_v26, 4  ;;  %v418_v47 = vsel %vm182_vm0, %v2336_v26, %v417_v50 }
  0xae   : > { %v482_v43 = vperm.slane %v474_v40, %v2842_v10  ;;  %v2327_v55 = vunpack.i.h.bf16 %v2325_v38  ;;  %v2326_v56 = vunpack.i.l.bf16 %v2325_v38  ;;  %v361_v61 = vsel %vm360_vm8, %v359_v57, %v2306_v54 }
  0xaf   : > { %v472_v7 = vsel %vm182_vm0, %v471_v29, %v2292_v60  ;;  %v369_v62 = vsel %vm360_vm8, %v368_v2, %v2307_v41  ;;  %v426_v63 = vperm.slane %v418_v47, %v2842_v10  ;;  %v3167_v60 = vsel %vm350_vm3, %v3033_v59, %v2362_v13 }
  0xb0   : > { %v3170_v11 = vperm.slane %v472_v7, %v2842_v10  ;;  %v495_v12 = vrot.slane %v482_v43, 4  ;;  %v416_v16 = vsel %vm182_vm0, %v415_v44, %v2291_v34  ;;  %v3180_v59 = vsel %vm362_vm9, %v361_v61, %v2326_v56 }
  0xb1   : > { %v3183_v25 = vsel %vm362_vm9, %v369_v62, %v2327_v55  ;;  %v3186_v30 = vperm.slane %v416_v16, %v2842_v10  ;;  %v439_v32 = vrot.slane %v426_v63, 4  ;;  %v3222_v62 = vpop.permute.xlu2 %2374 }
  0xb2   : > { %v3177_v24 = vpop.permute.xlu1 %2344  ;;  %v2376_v18 = vunpack.i.l.bf16 %v3222_v62 }
  0xb3   : > { %v2347_v50 = vunpack.i.h.bf16 %v3177_v24  ;;  %v2346_v26 = vunpack.i.l.bf16 %v3177_v24 }
  0xb5   : > { %v2330_v58 = vpop.permute.xlu0 %2329 }
  0xb6   : > { %v2332_v1 = vunpack.i.h.bf16 %v2330_v58  ;;  %v2331_v9 = vunpack.i.l.bf16 %v2330_v58 }
  0xb8   : > { %v459_v17 = vrot.slane %v2332_v1, 4  ;;  %v462_v19 = vsel %vm182_vm0, %v2332_v1, %v461_v3  ;;  %v403_v20 = vrot.slane %v2331_v9, 4  ;;  %v406_v21 = vsel %vm182_vm0, %v2331_v9, %v405_v45 }
  0xb9   : > { %v470_v22 = vperm.slane %v462_v19, %v2842_v10  ;;  %v414_v23 = vperm.slane %v406_v21, %v2842_v10  ;;  %v3232_v1 = vsel %vm350_vm3, %v3030_v15, %v2361_v33 }
  0xba   : > { %v460_v34 = vsel %vm182_vm0, %v459_v17, %v2287_v27  ;;  %v404_v35 = vsel %vm182_vm0, %v403_v20, %v2286_v46  ;;  %v3246_v17 = vpop.permute.xlu1 %2369  ;;  %v623_v20 = vrot.slane %v2346_v26, 4 }
  0xbb   : > { %v3191_v0 = vperm.slane %v460_v34, %v2842_v10  ;;  %v497_v36 = vrot.slane %v470_v22, 4  ;;  %v3194_v57 = vperm.slane %v404_v35, %v2842_v10  ;;  %v441_v2 = vrot.slane %v414_v23, 4 }
  0xbc   : > { %v440_v37 = vsel %vm182_vm0, %v439_v32, %v414_v23  ;;  %v496_v38 = vsel %vm182_vm0, %v495_v12, %v470_v22  ;;  %v427_v22 = vrot.slane %v3186_v30, 4  ;;  %v2372_v24 = vunpack.i.h.bf16 %v3246_v17 }
  0xbd   : > { %v485_v27 = vrot.slane %v3191_v0, 4  ;;  %v429_v46 = vrot.slane %v3194_v57, 4  ;;  %v2340_v29 = vpop.permute.xlu0 %2339  ;;  %v3203_v40 = vperm.slane %v440_v37, %v2873_v31  ;;  %v3206_v41 = vperm.slane %v496_v38, %v2873_v31 }
  0xbe   : > { %v2342_v54 = vunpack.i.h.bf16 %v2340_v29  ;;  %v2341_v14 = vunpack.i.l.bf16 %v2340_v29  ;;  %v442_v3 = vsel %vm182_vm0, %v426_v63, %v441_v2  ;;  %v498_v13 = vsel %vm182_vm0, %v482_v43, %v497_v36 }
  0xbf   : > { %v2443_v45 = vpack.i.bf16 %v3206_v41, %v3203_v40  ;;  %v3213_v44 = vperm.slane %v442_v3, %v2873_v31  ;;  %v3216_v47 = vperm.slane %v498_v13, %v2873_v31  ;;  %v430_v7 = vsel %vm182_vm0, %v3186_v30, %v429_v46 }
  0xc0   : > { %v666_v55 = vsel %vm182_vm0, %v665_v8, %v2342_v54  ;;  %v667_v56 = vrot.slane %v2342_v54, 4  ;;  %v610_v58 = vsel %vm182_vm0, %v609_v48, %v2341_v14  ;;  %v611_v61 = vrot.slane %v2341_v14, 4 }
  0xc1   : > { %v3225_v43 = vperm.slane %v666_v55, %v2842_v10  ;;  %2444 = vrot.lane.b32.xlu2 %v2443_v45, %s2735_s30  ;;  %v2448_v63 = vpack.i.bf16 %v3216_v47, %v3213_v44  ;;  %v2377_v8 = vunpack.i.h.bf16 %v3222_v62  ;;  %v3242_v12 = vperm.slane %v430_v7, %v2873_v31 }
  0xc2   : > { %v668_v48 = vsel %vm182_vm0, %v2352_v51, %v667_v56  ;;  %v612_v9 = vsel %vm182_vm0, %v2351_v52, %v611_v61  ;;  %v486_v16 = vsel %vm182_vm0, %v3170_v11, %v485_v27  ;;  %v3250_v33 = vperm.slane %v610_v58, %v2842_v10 }
  0xc3   : > { %v676_v15 = vperm.slane %v668_v48, %v2842_v10  ;;  %v620_v19 = vperm.slane %v612_v9, %v2842_v10  ;;  %2449 = vrot.lane.b32.xlu1 %v2448_v63, %s2739_s7  ;;  %v483_v51 = vrot.slane %v3170_v11, 4  ;;  %v679_v52 = vrot.slane %v2347_v50, 4 }
  0xc4   : > { %v3257_v21 = vperm.slane %v486_v16, %v2873_v31  ;;  %v2371_v32 = vunpack.i.l.bf16 %v3246_v17  ;;  %v455_v34 = vrot.slane %v3203_v40, 4  ;;  %v691_v35 = vrot.slane %v3225_v43, 4  ;;  %v3285_v16 = vpop.permute.xlu2 %2389 }
  0xc5   : > { %v2355_v23 = vpop.permute.xlu0 %2354  ;;  %v703_v37 = vrot.slane %v676_v15, 4  ;;  %v635_v38 = vrot.slane %v3250_v33, 4  ;;  %v647_v27 = vrot.slane %v620_v19, 4  ;;  %v511_v30 = vrot.slane %v3206_v41, 4 }
  0xc6   : > { %v2438_v36 = vpack.i.bf16 %v3257_v21, %v3242_v12  ;;  %v2357_v11 = vunpack.i.h.bf16 %v2355_v23  ;;  %v2356_v2 = vunpack.i.l.bf16 %v2355_v23  ;;  %v428_v13 = vsel %vm182_vm0, %v427_v22, %v3194_v57 }
  0xc7   : > { %v484_v45 = vsel %vm182_vm0, %v483_v51, %v3191_v0  ;;  %v453_v55 = vrot.slane %v3242_v12, 4  ;;  %v509_v56 = vrot.slane %v3257_v21, 4  ;;  %v3288_v0 = vperm.slane %v428_v13, %v2873_v31 }
  0xc8   : > { %2439 = vrot.lane.b32.xlu0 %v2438_v36, %s2736_s4  ;;  %v677_v46 = vrot.slane %v2357_v11, 4  ;;  %v680_v29 = vsel %vm182_vm0, %v2357_v11, %v679_v52  ;;  %v621_v54 = vrot.slane %v2356_v2, 4  ;;  %v624_v40 = vsel %vm182_vm0, %v2356_v2, %v623_v20 }
  0xc9   : > { %v688_v14 = vperm.slane %v680_v29, %v2842_v10  ;;  %v632_v3 = vperm.slane %v624_v40, %v2842_v10  ;;  %v451_v13 = vrot.slane %v3288_v0, 4 }
  0xca   : > { %v678_v41 = vsel %vm182_vm0, %v677_v46, %v2347_v50  ;;  %v622_v7 = vsel %vm182_vm0, %v621_v54, %v2346_v26  ;;  %v3291_v50 = vperm.slane %v484_v45, %v2873_v31  ;;  %v510_v45 = vsel %vm182_vm0, 0.0, %v509_v56 }
  0xcb   : > { %v684_v58 = vperm.slane %v678_v41, %v2842_v10  ;;  %v701_v61 = vrot.slane %v688_v14, 4  ;;  %v628_v63 = vperm.slane %v622_v7, %v2842_v10  ;;  %v645_v48 = vrot.slane %v632_v3, 4 }
  0xcc   : > { %v648_v9 = vsel %vm182_vm0, %v632_v3, %v647_v27  ;;  %v704_v57 = vsel %vm182_vm0, %v688_v14, %v703_v37  ;;  %v512_v14 = vsel %vm182_vm0, 0.0, %v511_v30  ;;  %v454_v3 = vsel %vm182_vm0, 0.0, %v453_v55 }
  0xcd   : > { %v689_v26 = vrot.slane %v684_v58, 4  ;;  %v633_v12 = vrot.slane %v628_v63, 4  ;;  %v2365_v17 = vpop.permute.xlu0 %2364  ;;  %v3294_v51 = vperm.slane %v648_v9, %v2873_v31  ;;  %v3297_v52 = vperm.slane %v704_v57, %v2873_v31 }
  0xce   : > { %v2367_v20 = vunpack.i.h.bf16 %v2365_v17  ;;  %v2366_v21 = vunpack.i.l.bf16 %v2365_v17  ;;  %v646_v22 = vsel %vm182_vm0, %v645_v48, %v620_v19  ;;  %v702_v23 = vsel %vm182_vm0, %v701_v61, %v676_v15  ;;  %v2405_v61 = vpop.permute.xlu2 %2404 }
  0xcf   : > { %v2463_v36 = vpack.i.bf16 %v3297_v52, %v3294_v51  ;;  %v3304_v11 = vperm.slane %v646_v22, %v2873_v31  ;;  %v3307_v2 = vperm.slane %v702_v23, %v2873_v31  ;;  %v636_v37 = vsel %vm182_vm0, %v628_v63, %v635_v38 }
  0xd0   : > { %v1000_v27 = vsel %vm352_vm4, %v3167_v60, %v2367_v20  ;;  %v993_v46 = vsel %vm352_vm4, %v3232_v1, %v2366_v21  ;;  %v644_v19 = vperm.slane %v636_v37, %v2873_v31  ;;  %v692_v15 = vsel %vm182_vm0, %v684_v58, %v691_v35  ;;  %v2385_v35 = vpop.permute.xlu1 %2384 }
  0xd1   : > { %v994_v29 = vsel %vm354_vm5, %v993_v46, %v2371_v32  ;;  %v1001_v54 = vsel %vm354_vm5, %v1000_v27, %v2372_v24  ;;  %2464 = vrot.lane.b32.xlu0 %v2463_v36, %s2739_s7  ;;  %v2458_v40 = vpack.i.bf16 %v3307_v2, %v3304_v11  ;;  %v700_v38 = vperm.slane %v692_v15, %v2873_v31 }
  0xd2   : > { %v995_v60 = vsel %vm356_vm6, %v994_v29, %v2376_v18  ;;  %v1002_v1 = vsel %vm356_vm6, %v1001_v54, %v2377_v8  ;;  %v456_v32 = vsel %vm182_vm0, 0.0, %v455_v34  ;;  %v507_v18 = vrot.slane %v3291_v50, 4 }
  0xd3   : > { %2459 = vrot.lane.b32.xlu1 %v2458_v40, %s2735_s30  ;;  %v2453_v24 = vpack.i.bf16 %v700_v38, %v644_v19  ;;  %v634_v62 = vsel %vm182_vm0, %v633_v12, %v3250_v33  ;;  %v690_v8 = vsel %vm182_vm0, %v689_v26, %v3225_v43  ;;  %v2387_v41 = vunpack.i.h.bf16 %v2385_v35 }
  0xd4   : > { %v2386_v7 = vunpack.i.l.bf16 %v2385_v35  ;;  %v2478_v55 = vpack.i.bf16 %v512_v14, %v456_v32  ;;  %v3341_v63 = vperm.slane %v634_v62, %v2873_v31  ;;  %v2473_v56 = vpack.i.bf16 %v510_v45, %v454_v3 }
  0xd5   : > { %2454 = vrot.lane.b32.xlu2 %v2453_v24, %s2736_s4  ;;  %v2380_v34 = vpop.permute.xlu0 %2379  ;;  %v452_v48 = vsel %vm182_vm0, 0.0, %v451_v13  ;;  %v659_v9 = vrot.slane %v644_v19, 4  ;;  %v3345_v33 = vperm.slane %v690_v8, %v2873_v31  ;;  %v508_v26 = vsel %vm182_vm0, 0.0, %v507_v18 }
  0xd6   : > { %v2382_v30 = vunpack.i.h.bf16 %v2380_v34  ;;  %v2381_v58 = vunpack.i.l.bf16 %v2380_v34  ;;  %v715_v12 = vrot.slane %v700_v38, 4  ;;  %v2407_v21 = vunpack.i.h.bf16 %v2405_v61 }
  0xd7   : > { %v2406_v22 = vunpack.i.l.bf16 %v2405_v61  ;;  %v657_v23 = vrot.slane %v3341_v63, 4  ;;  %v713_v36 = vrot.slane %v3345_v33, 4  ;;  %v2468_v37 = vpack.i.bf16 %v508_v26, %v452_v48 }
  0xd8   : > { %v996_v43 = vsel %vm358_vm7, %v995_v60, %v2381_v58  ;;  %v1003_v57 = vsel %vm358_vm7, %v1002_v1, %v2382_v30  ;;  %v457_v27 = vrot.slane %v3213_v44, 4  ;;  %v513_v46 = vrot.slane %v3216_v47, 4  ;;  %v2400_v29 = vpop.permute.xlu1 %2399 }
  0xd9   : > { %v997_v17 = vsel %vm360_vm8, %v996_v43, %v2386_v7  ;;  %v1004_v20 = vsel %vm360_vm8, %v1003_v57, %v2387_v41  ;;  %2479 = vrot.lane.b32.xlu0 %v2478_v55, %s2741_s9  ;;  %v660_v19 = vsel %vm182_vm0, 0.0, %v659_v9  ;;  %v716_v15 = vsel %vm182_vm0, 0.0, %v715_v12 }
  0xda   : > { %v2392_v54 = vunpack.i.h.bf16 %v3285_v16  ;;  %v2391_v40 = vunpack.i.l.bf16 %v3285_v16  ;;  %v1086_v38 = vrot.slane %v2407_v21, 4  ;;  %v1030_v60 = vrot.slane %v2406_v22, 4 }
  0xdb   : > { %2474 = vrot.lane.b32.xlu1 %v2473_v56, %s2737_s5  ;;  %v658_v44 = vsel %vm182_vm0, 0.0, %v657_v23  ;;  %v714_v47 = vsel %vm182_vm0, 0.0, %v713_v36  ;;  %v2493_v24 = vpack.i.bf16 %v716_v15, %v660_v19  ;;  %v458_v14 = vsel %vm182_vm0, 0.0, %v457_v27 }
  0xdc   : > { %v514_v3 = vsel %vm182_vm0, 0.0, %v513_v46  ;;  %v2402_v13 = vunpack.i.h.bf16 %v2400_v29  ;;  %v2401_v16 = vunpack.i.l.bf16 %v2400_v29  ;;  %v663_v62 = vrot.slane %v3294_v51, 4 }
  0xdd   : > { %2469 = vrot.lane.b32.xlu2 %v2468_v37, %s2738_s6  ;;  %v2395_v1 = vpop.permute.xlu0 %2394  ;;  %v2488_v8 = vpack.i.bf16 %v714_v47, %v658_v44  ;;  %v719_v34 = vrot.slane %v3297_v52, 4  ;;  %v661_v41 = vrot.slane %v3304_v11, 4  ;;  %v717_v7 = vrot.slane %v3307_v2, 4 }
  0xde   : > { %v2397_v35 = vunpack.i.h.bf16 %v2395_v1  ;;  %v2396_v32 = vunpack.i.l.bf16 %v2395_v1  ;;  %v3373_v30 = vsel %vm362_vm9, %v997_v17, %v2391_v40  ;;  %v3376_v58 = vsel %vm362_vm9, %v1004_v20, %v2392_v54 }
  0xdf   : > { %v2483_v51 = vpack.i.bf16 %v514_v3, %v458_v14  ;;  %v1100_v11 = vrot.slane %v2402_v13, 4  ;;  %v1044_v48 = vrot.slane %v2401_v16, 4  ;;  %v664_v9 = vsel %vm182_vm0, 0.0, %v663_v62 }
  0xe0   : > { %v1088_v45 = vrot.slane %v2397_v35, 4  ;;  %v1032_v18 = vrot.slane %v2396_v32, 4  ;;  %v1087_v56 = vsel %vm182_vm0, %v1086_v38, %v2397_v35  ;;  %v1031_v52 = vsel %vm182_vm0, %v1030_v60, %v2396_v32 }
  0xe1   : > { %2494 = vrot.lane.b32.xlu0 %v2493_v24, %s2737_s5  ;;  %v720_v43 = vsel %vm182_vm0, 0.0, %v719_v34  ;;  %v662_v57 = vsel %vm182_vm0, 0.0, %v661_v41  ;;  %v718_v26 = vsel %vm182_vm0, 0.0, %v717_v7  ;;  %v1037_v23 = vperm.slane %v1031_v52, %v2842_v10 }
  0xe2   : > { %v1089_v55 = vsel %vm182_vm0, %v2407_v21, %v1088_v45  ;;  %v1033_v61 = vsel %vm182_vm0, %v2406_v22, %v1032_v18  ;;  %v1093_v22 = vperm.slane %v1087_v56, %v2842_v10  ;;  %v2503_v29 = vpack.i.bf16 %v720_v43, %v664_v9 }
  0xe3   : > { %2489 = vrot.lane.b32.xlu1 %v2488_v8, %s2738_s6  ;;  %v1097_v12 = vperm.slane %v1089_v55, %v2842_v10  ;;  %v1041_v17 = vperm.slane %v1033_v61, %v2842_v10  ;;  %v2498_v54 = vpack.i.bf16 %v718_v26, %v662_v57  ;;  %v1056_v14 = vrot.slane %v1037_v23, 4 }
  0xe4   : > { %v1112_v24 = vrot.slane %v1093_v22, 4 }
  0xe5   : > { %2484 = vrot.lane.b32.xlu2 %v2483_v51, %s2740_s8  ;;  %v2410_v2 = vpop.permute.xlu0 %2409  ;;  %v1124_v40 = vrot.slane %v1097_v12, 4  ;;  %v1068_v38 = vrot.slane %v1041_v17, 4 }
  0xe6   : > { %v2412_v20 = vunpack.i.h.bf16 %v2410_v2  ;;  %v2411_v21 = vunpack.i.l.bf16 %v2410_v2 }
  0xe8   : > { %v1098_v36 = vrot.slane %v2412_v20, 4  ;;  %v1101_v37 = vsel %vm182_vm0, %v2412_v20, %v1100_v11  ;;  %v1042_v27 = vrot.slane %v2411_v21, 4  ;;  %v1045_v46 = vsel %vm182_vm0, %v2411_v21, %v1044_v48 }
  0xe9   : > { %v1109_v19 = vperm.slane %v1101_v37, %v2842_v10  ;;  %v1053_v15 = vperm.slane %v1045_v46, %v2842_v10 }
  0xea   : > { %v1099_v60 = vsel %vm182_vm0, %v1098_v36, %v2402_v13  ;;  %v1043_v1 = vsel %vm182_vm0, %v1042_v27, %v2401_v16 }
  0xeb   : > { %v1105_v35 = vperm.slane %v1099_v60, %v2842_v10  ;;  %v1122_v32 = vrot.slane %v1109_v19, 4  ;;  %v1049_v44 = vperm.slane %v1043_v1, %v2842_v10  ;;  %v1066_v47 = vrot.slane %v1053_v15, 4  ;;  %2504 = vrot.lane.b32.xlu1 %v2503_v29, %s2740_s8 }
  0xec   : > { %v1069_v3 = vsel %vm182_vm0, %v1053_v15, %v1068_v38  ;;  %v1125_v45 = vsel %vm182_vm0, %v1109_v19, %v1124_v40 }
  0xed   : > { %v1110_v18 = vrot.slane %v1105_v35, 4  ;;  %v1054_v62 = vrot.slane %v1049_v44, 4  ;;  %2499 = vrot.lane.b32.xlu2 %v2498_v54, %s2741_s9  ;;  %v1077_v13 = vperm.slane %v1069_v3, %v2873_v31  ;;  %v1133_v16 = vperm.slane %v1125_v45, %v2873_v31  ;;  %v2667_v3 = vld [vmem:[%s2817_s28 + $0x10] sm:$0x3] }
  0xee   : > { %v1067_v8 = vsel %vm182_vm0, %v1066_v47, %v1041_v17  ;;  %v1123_v34 = vsel %vm182_vm0, %v1122_v32, %v1097_v12  ;;  %v1057_v41 = vsel %vm182_vm0, %v1049_v44, %v1056_v14  ;;  %v1113_v7 = vsel %vm182_vm0, %v1105_v35, %v1112_v24  ;;  %v3441_v32 = vpop.permute.xlu1 %1847  ;;  %v2665_v44 = vld [vmem:[%s2817_s28] sm:$0xff]  ;;  %v2666_v24 = vld [vmem:[%s2817_s28 + $0x8] sm:$0xff] }
  0xef   : > { %v2518_v55 = vpack.i.bf16 %v1133_v16, %v1077_v13  ;;  %v1073_v61 = vperm.slane %v1067_v8, %v2873_v31  ;;  %v1129_v51 = vperm.slane %v1123_v34, %v2873_v31  ;;  %v1065_v56 = vperm.slane %v1057_v41, %v2873_v31 }
  0xf0   : > { %v1121_v52 = vperm.slane %v1113_v7, %v2873_v31  ;;  %v1055_v11 = vsel %vm182_vm0, %v1054_v62, %v1037_v23  ;;  %v1111_v48 = vsel %vm182_vm0, %v1110_v18, %v1093_v22  ;;  %v1084_v54 = vrot.slane %v1077_v13, 4  ;;  %v2420_v18 = vpop.permute.xlu0 %2419 }
  0xf1   : > { %2519 = vrot.lane.b32.xlu0 %v2518_v55, %s2739_s7  ;;  %v2513_v2 = vpack.i.bf16 %v1129_v51, %v1073_v61  ;;  %v1080_v9 = vrot.slane %v1065_v56, 4  ;;  %v3418_v43 = vperm.slane %v1055_v11, %v2873_v31  ;;  %v3421_v57 = vperm.slane %v1111_v48, %v2873_v31 }
  0xf2   : > { %v2508_v26 = vpack.i.bf16 %v1121_v52, %v1065_v56  ;;  %v1136_v12 = vrot.slane %v1121_v52, 4  ;;  %v1082_v23 = vrot.slane %v1073_v61, 4  ;;  %v1138_v36 = vrot.slane %v1129_v51, 4 }
  0xf3   : > { %2514 = vrot.lane.b32.xlu1 %v2513_v2, %s2735_s30  ;;  %v1078_v17 = vrot.slane %v3418_v43, 4  ;;  %v1134_v20 = vrot.slane %v3421_v57, 4  ;;  %v1081_v21 = vsel %vm182_vm0, 0.0, %v1080_v9  ;;  %v1140_v40 = vrot.slane %v1133_v16, 4  ;;  %v3448_v16 = vpop.permute.xlu2 %2414 }
  0xf4   : > { %v1137_v22 = vsel %vm182_vm0, 0.0, %v1136_v12  ;;  %v1083_v19 = vsel %vm182_vm0, 0.0, %v1082_v23  ;;  %v1139_v15 = vsel %vm182_vm0, 0.0, %v1138_v36  ;;  %v1085_v60 = vsel %vm182_vm0, 0.0, %v1084_v54 }
  0xf5   : > { %2509 = vrot.lane.b32.xlu2 %v2508_v26, %s2736_s4  ;;  %v1079_v37 = vsel %vm182_vm0, 0.0, %v1078_v17  ;;  %v1135_v27 = vsel %vm182_vm0, 0.0, %v1134_v20  ;;  %v2528_v46 = vpack.i.bf16 %v1137_v22, %v1081_v21  ;;  %v2533_v38 = vpack.i.bf16 %v1139_v15, %v1083_v19 }
  0xf6   : > { %v2523_v29 = vpack.i.bf16 %v1135_v27, %v1079_v37  ;;  %v1141_v1 = vsel %vm182_vm0, 0.0, %v1140_v40  ;;  %v1419_v47 = vrot.slane %v2665_v44, 2  ;;  %v1420_v14 = vrot.slane %v2666_v24, 2  ;;  %v2430_v55 = vpop.permute.xlu1 %2429 }
  0xf7   : > { %v2538_v35 = vpack.i.bf16 %v1141_v1, %v1085_v60  ;;  %v1422_v45 = vrot.slane %v2667_v3, 2  ;;  %v2422_v62 = vunpack.i.h.bf16 %v2420_v18  ;;  %v2421_v13 = vunpack.i.l.bf16 %v2420_v18 }
  0xf8   : > { %v3453_v8 = vsel %vm1418_vm2, %v1419_v47, %v1420_v14  ;;  %v2432_v51 = vunpack.i.h.bf16 %v2430_v55  ;;  %v2431_v56 = vunpack.i.l.bf16 %v2430_v55  ;;  %v3487_v21 = vpop.permute.xlu0 %2424 }
  0xf9   : > { %2529 = vrot.lane.b32.xlu0 %v2528_v46, %s2737_s5  ;;  %v3456_v34 = vsel %vm1418_vm2, %v1420_v14, %v1422_v45  ;;  %v1721_v41 = vrot.slane %v2422_v62, 4  ;;  %v1665_v7 = vrot.slane %v2421_v13, 4 }
  0xfa   : > { %v2553_v61 = vpack.i.bf16 %v3456_v34, %v3453_v8  ;;  %v1723_v52 = vrot.slane %v2432_v51, 4  ;;  %v1667_v48 = vrot.slane %v2431_v56, 4 }
  0xfb   : > { %2524 = vrot.lane.b32.xlu1 %v2523_v29, %s2738_s6  ;;  %v3465_v11 = vsel %vm182_vm0, %v1665_v7, %v2431_v56  ;;  %v3468_v2 = vsel %vm182_vm0, %v1721_v41, %v2432_v51  ;;  %v3477_v26 = vpop.permute.xlu2 %1849 }
  0xfc   : > { %v3472_v9 = vsel %vm182_vm0, %v2421_v13, %v1667_v48 }
  0xfd   : > { %2534 = vrot.lane.b32.xlu2 %v2533_v38, %s2741_s9 }
 0x101   : > { %1839 = vrot.lane.b32.xlu0 %v3112_v28, %s2742_s10 }
 0x103   : > { %2539 = vrot.lane.b32.xlu1 %v2538_v35, %s2740_s8  ;;  %v3485_v12 = vpop.permute.xlu2 %2434 }
 0x105   : > { %1843 = vrot.lane.b32.xlu2 %v3116_v4, %s2742_s10 }
 0x109   : > { %1845 = vrot.lane.b32.xlu0 %v3119_v49, %s2742_s10 }
 0x10b   : > { %1841 = vrot.lane.b32.xlu1 %v3109_v6, %s2742_s10 }
 0x10d   : > { %2549 = vrot.lane.b32.xlu2 %v3069_v39, %s2742_s10  ;;  %v3475_v39 = vsel %vm182_vm0, %v2422_v62, %v1723_v52 }
 0x111   : > { %2554 = vrot.lane.b32.xlu0 %v2553_v61, %s2734_s29  ;;  %s2151_s29 = scalar_lea.hbm %s4285_s3, %s2230_s26 }
 0x113   : > { %2544 = vrot.lane.b32.xlu1 %v3057_v5, %s2742_s10 }
 0x115   : > { %1837 = vrot.lane.b32.xlu2 %v3456_v34, %s2742_s10 }
 0x11b   : > { %1835 = vrot.lane.b32.xlu1 %v3453_v8, %s2742_s10  ;;  %v2445_v17 = vpop.permute.xlu2 %2444  ;;  %s2688_s10 = scalar_lea.hbm %s4285_s3, 32 }
 0x11c   : > { %v2447_v24 = vunpack.i.h.bf16 %v2445_v17  ;;  %v2446_v14 = vunpack.i.l.bf16 %v2445_v17 }
 0x12f   : > { %v2455_v20 = vpop.permute.xlu2 %2454 }
 0x130   : > { %v2457_v13 = vunpack.i.h.bf16 %v2455_v20  ;;  %v2456_v41 = vunpack.i.l.bf16 %v2455_v20 }
 0x135   : > { %v2450_v15 = vpop.permute.xlu1 %2449 }
 0x136   : > { %v2452_v61 = vunpack.i.h.bf16 %v2450_v15  ;;  %v2451_v51 = vunpack.i.l.bf16 %v2450_v15 }
 0x137   : > { %v2470_v22 = vpop.permute.xlu2 %2469 }
 0x138   : > { %v2472_v23 = vunpack.i.h.bf16 %v2470_v22  ;;  %v2471_v36 = vunpack.i.l.bf16 %v2470_v22 }
 0x13a   : > { %v578_v37 = vsel %vm350_vm3, %v3291_v50, %v2472_v23  ;;  %v571_v5 = vsel %vm350_vm3, %v3288_v0, %v2471_v36  ;;  %v2440_v27 = vpop.permute.xlu0 %2439 }
 0x13b   : > { %v2442_v46 = vunpack.i.h.bf16 %v2440_v27  ;;  %v2441_v19 = vunpack.i.l.bf16 %v2440_v27 }
 0x13d   : > { %v572_v29 = vsel %vm352_vm4, %v571_v5, %v2441_v19  ;;  %v579_v54 = vsel %vm352_vm4, %v578_v37, %v2442_v46 }
 0x13f   : > { %v2485_v40 = vpop.permute.xlu2 %2484 }
 0x140   : > { %v2487_v48 = vunpack.i.h.bf16 %v2485_v40  ;;  %v2486_v17 = vunpack.i.l.bf16 %v2485_v40 }
 0x143   : > { %v3495_v38 = vpop.permute.xlu0 %2464 }
 0x145   : > { %v2460_v60 = vpop.permute.xlu1 %2459 }
 0x147   : > { %v2500_v1 = vpop.permute.xlu2 %2499 }
 0x14b   : > { %v2480_v35 = vpop.permute.xlu0 %2479 }
 0x14c   : > { %v2482_v22 = vunpack.i.h.bf16 %v2480_v35  ;;  %v2481_v23 = vunpack.i.l.bf16 %v2480_v35 }
 0x14d   : > { %v2475_v44 = vpop.permute.xlu1 %2474 }
 0x14e   : > { %v2477_v47 = vunpack.i.h.bf16 %v2475_v44  ;;  %v2476_v50 = vunpack.i.l.bf16 %v2475_v44 }
 0x14f   : > { %v3501_v62 = vpop.permute.xlu2 %2509 }
 0x150   : > { %v573_v0 = vsel %vm354_vm5, %v572_v29, %v2476_v50  ;;  %v580_v3 = vsel %vm354_vm5, %v579_v54, %v2477_v47 }
 0x151   : > { %v574_v45 = vsel %vm356_vm6, %v573_v0, %v2446_v14  ;;  %v581_v18 = vsel %vm356_vm6, %v580_v3, %v2447_v24  ;;  %v2462_v3 = vunpack.i.h.bf16 %v2460_v60 }
 0x152   : > { %v575_v19 = vsel %vm358_vm7, %v574_v45, %v2481_v23  ;;  %v582_v15 = vsel %vm358_vm7, %v581_v18, %v2482_v22  ;;  %v2461_v45 = vunpack.i.l.bf16 %v2460_v60  ;;  %v2502_v18 = vunpack.i.h.bf16 %v2500_v1 }
 0x153   : > { %v2495_v7 = vpop.permute.xlu0 %2494  ;;  %v576_v40 = vsel %vm360_vm8, %v575_v19, %v2451_v51  ;;  %v583_v35 = vsel %vm360_vm8, %v582_v15, %v2452_v61  ;;  %v2049_v23 = vrot.slane %v3373_v30, 4 }
 0x154   : > { %v2497_v36 = vunpack.i.h.bf16 %v2495_v7  ;;  %v2496_v37 = vunpack.i.l.bf16 %v2495_v7  ;;  %v2466_v7 = vunpack.i.l.bf16 %v3495_v38 }
 0x155   : > { %v2490_v55 = vpop.permute.xlu1 %2489 }
 0x156   : > { %v2492_v56 = vunpack.i.h.bf16 %v2490_v55  ;;  %v2491_v52 = vunpack.i.l.bf16 %v2490_v55 }
 0x157   : > { %v3517_v44 = vpop.permute.xlu2 %2534 }
 0x158   : > { %v784_v5 = vsel %vm350_vm3, %v3345_v33, %v2492_v56  ;;  %v777_v27 = vsel %vm350_vm3, %v3341_v63, %v2491_v52  ;;  %v577_v33 = vsel %vm362_vm9, %v576_v40, %v2486_v17  ;;  %v584_v63 = vsel %vm362_vm9, %v583_v35, %v2487_v48 }
 0x159   : > { %v785_v20 = vsel %vm352_vm4, %v784_v5, %v2457_v13  ;;  %v778_v46 = vsel %vm352_vm4, %v777_v27, %v2456_v41  ;;  %v2043_v47 = vrot.slane %v577_v33, 4  ;;  %v2044_v50 = vrot.slane %v584_v63, 4 }
 0x15a   : > { %v786_v29 = vsel %vm354_vm5, %v785_v20, %v2497_v36  ;;  %v779_v54 = vsel %vm354_vm5, %v778_v46, %v2496_v37  ;;  %v2501_v13 = vunpack.i.l.bf16 %v2500_v1  ;;  %v2467_v41 = vunpack.i.h.bf16 %v3495_v38 }
 0x15b   : > { %v3521_v14 = vsel %vm2065_vm10, %v3180_v59, %v2043_v47  ;;  %v3525_v0 = vsel %vm2065_vm10, %v3183_v25, %v2044_v50  ;;  %v780_v55 = vsel %vm356_vm6, %v779_v54, %v2461_v45  ;;  %v787_v61 = vsel %vm356_vm6, %v786_v29, %v2462_v3 }
 0x15c   : > { %4291 = vst [vmem:[#allocation5_spill] sm:$0xff] %v3521_v14  ;;  %v781_v52 = vsel %vm358_vm7, %v780_v55, %v2501_v13  ;;  %v788_v25 = vsel %vm358_vm7, %v787_v61, %v2502_v18  ;;  %v1515_v38 = vrot.slane %v3086_v42, 4  ;;  %v1459_v17 = vrot.slane %v3094_v53, 4 }
 0x15d   : > { %v2505_v24 = vpop.permute.xlu1 %2504  ;;  %4292 = vst [vmem:[#allocation6_spill] sm:$0xff] %v3525_v0  ;;  %v782_v60 = vsel %vm360_vm8, %v781_v52, %v2466_v7  ;;  %v789_v1 = vsel %vm360_vm8, %v788_v25, %v2467_v41  ;;  %v2050_v36 = vrot.slane %v3376_v58, 4  ;;  %v1517_v46 = vrot.slane %v3109_v6, 4 }
 0x15e   : > { %v2507_v51 = vunpack.i.h.bf16 %v2505_v24  ;;  %v2506_v56 = vunpack.i.l.bf16 %v2505_v24  ;;  %v1516_v19 = vsel %vm182_vm0, %v1515_v38, %v3109_v6  ;;  %v1460_v30 = vsel %vm182_vm0, %v1459_v17, %v3112_v28 }
 0x15f   : > { %v3541_v22 = vpop.permute.xlu2 %1843  ;;  %v1461_v58 = vrot.slane %v3112_v28, 4  ;;  %v1518_v29 = vsel %vm182_vm0, %v3086_v42, %v1517_v46  ;;  %v3562_v54 = vperm.slane %v1516_v19, %v2842_v10  ;;  %v3565_v40 = vperm.slane %v1460_v30, %v2842_v10 }
 0x160   : > { %v783_v37 = vsel %vm362_vm9, %v782_v60, %v2506_v56  ;;  %v790_v5 = vsel %vm362_vm9, %v789_v1, %v2507_v51  ;;  %v1447_v6 = vrot.slane %v3116_v4, 4  ;;  %v1503_v28 = vrot.slane %v3119_v49, 4 }
 0x161   : > { %v3548_v27 = vsel %vm2065_vm10, %v783_v37, %v2049_v23  ;;  %v3551_v20 = vsel %vm2065_vm10, %v790_v5, %v2050_v36  ;;  %v1462_v33 = vsel %vm182_vm0, %v3094_v53, %v1461_v58  ;;  %v2417_v50 = vunpack.i.h.bf16 %v3448_v16 }
 0x162   : > { %4293 = vst [vmem:[#allocation7_spill] sm:$0xff] %v3548_v27  ;;  %v2512_v42 = vunpack.i.h.bf16 %v3501_v62  ;;  %v2511_v24 = vunpack.i.l.bf16 %v3501_v62  ;;  %v2416_v41 = vunpack.i.l.bf16 %v3448_v16  ;;  %v2437_v7 = vunpack.i.h.bf16 %v3485_v12 }
 0x163   : > { %v3531_v59 = vpop.permute.xlu0 %2519  ;;  %4294 = vst [vmem:[#allocation8_spill] sm:$0xff] %v3551_v20  ;;  %v1448_v62 = vsel %vm182_vm0, %v1447_v6, %v3453_v8  ;;  %v4288_v51 = vunpack.i.l.bf16 %v3485_v12  ;;  %v3590_v52 = vperm.slane %v1518_v29, %v2842_v10  ;;  %v3596_v25 = vperm.slane %v3465_v11, %v2842_v10 }
 0x164   : > { %v3600_v60 = vperm.slane %v3468_v2, %v2842_v10  ;;  %v3605_v38 = vperm.slane %v1462_v33, %v2842_v10  ;;  %v1294_v17 = vrot.slane %v2417_v50, 4  ;;  %v4287_v23 = vunpack.i.h.bf16 %v3487_v21 }
 0x165   : > { %v3537_v48 = vpop.permute.xlu1 %2514  ;;  %v4286_v36 = vunpack.i.l.bf16 %v3487_v21  ;;  %v1238_v11 = vrot.slane %v2416_v41, 4  ;;  %v1927_v37 = vrot.slane %v3477_v26, 4  ;;  %v3615_v2 = vperm.slane %v1448_v62, %v2842_v10 }
 0x166   : > { %v3619_v5 = vrot.slane %v2437_v7, 4  ;;  %v3626_v30 = vrot.slane %v4288_v51, 4  ;;  %v1871_v58 = vrot.slane %v3441_v32, 4  ;;  %v3632_v29 = vperm.slane %v3472_v9, %v2842_v10 }
 0x167   : > { %v3574_v3 = vpop.permute.xlu2 %2549  ;;  %v3637_v33 = vperm.slane %v3475_v39, %v2842_v10  ;;  %v2516_v9 = vunpack.i.l.bf16 %v3537_v48  ;;  %v2536_v39 = vunpack.i.l.bf16 %v3517_v44 }
 0x16b   : > { %v2530_v15 = vpop.permute.xlu0 %2529 }
 0x16c   : > { %v2532_v45 = vunpack.i.h.bf16 %v2530_v15  ;;  %v2531_v18 = vunpack.i.l.bf16 %v2530_v15  ;;  %v2552_v15 = vunpack.i.h.bf16 %v3574_v3 }
 0x16d   : > { %v2525_v35 = vpop.permute.xlu1 %2524 }
 0x16e   : > { %v2527_v63 = vunpack.i.h.bf16 %v2525_v35  ;;  %v2526_v47 = vunpack.i.l.bf16 %v2525_v35 }
 0x170   : > { %v1205_v13 = vsel %vm350_vm3, %v3421_v57, %v2527_v63  ;;  %v1198_v53 = vsel %vm350_vm3, %v3418_v43, %v2526_v47  ;;  %v1504_v43 = vsel %vm182_vm0, %v1503_v28, %v3456_v34  ;;  %v3642_v63 = vrot.slane %v4287_v23, 4 }
 0x171   : > { %v1199_v55 = vsel %vm352_vm4, %v1198_v53, %v2511_v24  ;;  %v1206_v61 = vsel %vm352_vm4, %v1205_v13, %v2512_v42  ;;  %v3622_v19 = vperm.slane %v1504_v43, %v2842_v10  ;;  %v3646_v47 = vrot.slane %v4286_v36, 4  ;;  %v1838_v42 = vpop.permute.xlu2 %1837 }
 0x172   : > { %v1200_v56 = vsel %vm354_vm5, %v1199_v55, %v2531_v18  ;;  %v1207_v57 = vsel %vm354_vm5, %v1206_v61, %v2532_v45  ;;  %v2517_v28 = vunpack.i.h.bf16 %v3537_v48  ;;  %v2537_v24 = vunpack.i.h.bf16 %v3517_v44 }
 0x173   : > { %v3602_v1 = vpop.permute.xlu0 %1839  ;;  %v2522_v45 = vunpack.i.h.bf16 %v3531_v59  ;;  %v2551_v18 = vunpack.i.l.bf16 %v3574_v3  ;;  %v2521_v13 = vunpack.i.l.bf16 %v3531_v59  ;;  %v1292_v53 = vrot.slane %v2552_v15, 4 }
 0x174   : > { %v1201_v55 = vsel %vm356_vm6, %v1200_v56, %v2516_v9  ;;  %v1208_v61 = vsel %vm356_vm6, %v1207_v57, %v2517_v28  ;;  %v1917_v43 = vrot.slane %v1838_v42, 4  ;;  %v1859_v56 = vrot.slane %v3541_v22, 4 }
 0x175   : > { %v2540_v46 = vpop.permute.xlu1 %2539  ;;  %v1202_v48 = vsel %vm358_vm7, %v1201_v55, %v2536_v39  ;;  %v1209_v23 = vsel %vm358_vm7, %v1208_v61, %v2537_v24  ;;  %v1236_v57 = vrot.slane %v2551_v18, 4  ;;  %v1293_v9 = vsel %vm182_vm0, %v1292_v53, %v2417_v50 }
 0x176   : > { %v2541_v62 = vunpack.i.l.bf16 %v2540_v46  ;;  %v2542_v6 = vunpack.i.h.bf16 %v2540_v46  ;;  %v1203_v35 = vsel %vm360_vm8, %v1202_v48, %v2521_v13  ;;  %v1210_v3 = vsel %vm360_vm8, %v1209_v23, %v2522_v45 }
 0x177   : > { %v1295_v24 = vsel %vm182_vm0, %v2552_v15, %v1294_v17  ;;  %v1471_v50 = vrot.slane %v3565_v40, 4  ;;  %v1527_v17 = vrot.slane %v3562_v54, 4  ;;  %v1872_v15 = vsel %vm182_vm0, %v1871_v58, %v3602_v1 }
 0x178   : > { %v3675_v55 = vsel %vm362_vm9, %v1203_v35, %v2541_v62  ;;  %v1239_v53 = vsel %vm182_vm0, %v2551_v18, %v1238_v11  ;;  %v3715_v18 = vperm.slane %v1872_v15, %v2842_v10 }
 0x179   : > { %v1528_v16 = vsel %vm182_vm0, %v1527_v17, %v3622_v19 }
 0x17b   : > { %v1846_v36 = vpop.permute.xlu0 %1845 }
 0x17c   : > { %v1915_v44 = vrot.slane %v1846_v36, 4  ;;  %v1918_v23 = vsel %vm182_vm0, %v1846_v36, %v1917_v43  ;;  %v1237_v36 = vsel %vm182_vm0, %v1236_v57, %v2416_v41  ;;  %v3702_v41 = vperm.slane %v1293_v9, %v2842_v10 }
 0x17d   : > { %v1842_v28 = vpop.permute.xlu1 %1841  ;;  %v3708_v62 = vperm.slane %v1918_v23, %v2842_v10  ;;  %v3712_v11 = vperm.slane %v1237_v36, %v2842_v10  ;;  %v3718_v57 = vperm.slane %v1239_v53, %v2842_v10 }
 0x17e   : > { %v1928_v46 = vsel %vm182_vm0, %v1927_v37, %v1842_v28  ;;  %v1929_v39 = vrot.slane %v1842_v28, 4  ;;  %v1916_v13 = vsel %vm182_vm0, %v1915_v44, %v1838_v42  ;;  %v3682_v37 = vsel %vm362_vm9, %v1210_v3, %v2542_v6 }
 0x17f   : > { %v3672_v45 = vperm.slane %v1928_v46, %v2842_v10  ;;  %v1472_v6 = vsel %vm182_vm0, %v1471_v50, %v3615_v2  ;;  %v3705_v58 = vperm.slane %v1916_v13, %v2842_v10 }
 0x180   : > { %v1930_v61 = vsel %vm182_vm0, %v3477_v26, %v1929_v39  ;;  %v3694_v26 = vperm.slane %v1295_v24, %v2842_v10  ;;  %v3723_v24 = vperm.slane %v1472_v6, %v2873_v31  ;;  %v1883_v6 = vrot.slane %v3715_v18, 4 }
 0x181   : > { %v3690_v35 = vperm.slane %v1930_v61, %v2842_v10  ;;  %v1939_v42 = vrot.slane %v3672_v45, 4  ;;  %v3734_v61 = vperm.slane %v1528_v16, %v2873_v31 }
 0x183   : > { %v1951_v43 = vrot.slane %v3690_v35, 4  ;;  %v2555_v48 = vpop.permute.xlu0 %2554  ;;  %v1940_v9 = vsel %vm182_vm0, %v1939_v42, %v3705_v58 }
 0x184   : > { %v2557_v44 = vunpack.i.h.bf16 %v2555_v48  ;;  %v2556_v3 = vunpack.i.l.bf16 %v2555_v48  ;;  %v3745_v48 = vperm.slane %v1940_v9, %v2873_v31  ;;  %v1551_v9 = vrot.slane %v3734_v61, 4 }
 0x185   : > { %v2545_v28 = vpop.permute.xlu1 %2544  ;;  %v3727_v46 = vsel %vm182_vm0, %v1951_v43, %v3708_v62 }
 0x186   : > { %v1710_v39 = vsel %vm182_vm0, %v3619_v5, %v2557_v44  ;;  %v1711_v13 = vrot.slane %v2557_v44, 4  ;;  %v1654_v23 = vsel %vm182_vm0, %v3626_v30, %v2556_v3  ;;  %v2547_v36 = vunpack.i.h.bf16 %v2545_v28 }
 0x187   : > { %v1716_v50 = vperm.slane %v1710_v39, %v2842_v10  ;;  %v1660_v17 = vperm.slane %v1654_v23, %v2842_v10  ;;  %v2546_v15 = vunpack.i.l.bf16 %v2545_v28  ;;  %v1655_v5 = vrot.slane %v2556_v3, 4 }
 0x188   : > { %v1712_v30 = vsel %vm182_vm0, %v2437_v7, %v1711_v13  ;;  %v1305_v39 = vsel %vm182_vm0, %v3642_v63, %v2547_v36  ;;  %v1495_v13 = vrot.slane %v3723_v24, 4  ;;  %v4295_v28 = vunpack.i.l.bf16 %v3485_v12 }
 0x189   : > { %v1735_v43 = vrot.slane %v1716_v50, 4  ;;  %v1679_v16 = vrot.slane %v1660_v17, 4  ;;  %v1249_v23 = vsel %vm182_vm0, %v3646_v47, %v2546_v15  ;;  %v3754_v3 = vperm.slane %v1305_v39, %v2842_v10 }
 0x18a   : > { %v1255_v7 = vperm.slane %v1249_v23, %v2842_v10  ;;  %v3760_v51 = vperm.slane %v1712_v30, %v2842_v10  ;;  %v1656_v44 = vsel %vm182_vm0, %v4295_v28, %v1655_v5  ;;  %v1306_v39 = vrot.slane %v2547_v36, 4 }
 0x18b   : > { %v1680_v63 = vsel %vm182_vm0, %v3596_v25, %v1679_v16  ;;  %v1736_v47 = vsel %vm182_vm0, %v3600_v60, %v1735_v43  ;;  %v1316_v23 = vrot.slane %v3754_v3, 4  ;;  %v1250_v59 = vrot.slane %v2546_v15, 4 }
 0x18c   : > { %v1260_v30 = vrot.slane %v1255_v7, 4  ;;  %v1688_v5 = vperm.slane %v1680_v63, %v2873_v31  ;;  %v1744_v16 = vperm.slane %v1736_v47, %v2873_v31  ;;  %v3780_v43 = vperm.slane %v1656_v44, %v2842_v10 }
 0x18d   : > { %v3770_v42 = vpop.permute.xlu1 %1835  ;;  %v4296_v15 = vrot.slane %v3596_v25, 4  ;;  %v3787_v53 = vsel %vm182_vm0, 0.0, %v1495_v13  ;;  %v4297_v63 = vrot.slane %v3600_v60, 4  ;;  %v4298_v47 = vunpack.i.h.bf16 %v3487_v21 }
 0x18e   : > { %v1860_v12 = vsel %vm182_vm0, %v1859_v56, %v3770_v42  ;;  %v2563_v14 = vpack.i.bf16 %v1744_v16, %v1688_v5  ;;  %v4299_v25 = vunpack.i.l.bf16 %v3487_v21  ;;  %v1317_v21 = vsel %vm182_vm0, %v1316_v23, %v3702_v41 }
 0x18f   : > { %v1866_v36 = vperm.slane %v1860_v12, %v2842_v10  ;;  %v1678_v28 = vsel %vm182_vm0, %v4296_v15, %v1660_v17  ;;  %v1734_v44 = vsel %vm182_vm0, %v4297_v63, %v1716_v50  ;;  %v1307_v12 = vsel %vm182_vm0, %v4298_v47, %v1306_v39 }
 0x190   : > { %v3791_v56 = vperm.slane %v1678_v28, %v2873_v31  ;;  %v1251_v17 = vsel %vm182_vm0, %v4299_v25, %v1250_v59  ;;  %v3803_v13 = vperm.slane %v1734_v44, %v2873_v31  ;;  %2564 = vrot.lane.b32.xlu1 %v2563_v14, %s2736_s4  ;;  %v1261_v50 = vsel %vm182_vm0, %v1260_v30, %v3712_v11 }
 0x191   : > { %v1884_v15 = vsel %vm182_vm0, %v1883_v6, %v1866_v36  ;;  %v3818_v63 = vperm.slane %v1261_v50, %v2873_v31  ;;  %v3821_v14 = vperm.slane %v1317_v21, %v2873_v31  ;;  %v3824_v6 = vperm.slane %v1307_v12, %v2842_v10 }
 0x192   : > { %v1701_v28 = vrot.slane %v3791_v56, 4  ;;  %v3809_v60 = vperm.slane %v1884_v15, %v2873_v31  ;;  %v1757_v39 = vrot.slane %v3803_v13, 4  ;;  %v1552_v47 = vsel %vm182_vm0, 0.0, %v1551_v9 }
 0x193   : > { %v3830_v23 = vperm.slane %v1251_v17, %v2842_v10  ;;  %v1284_v15 = vrot.slane %v3818_v63, 4  ;;  %v1340_v50 = vrot.slane %v3821_v14, 4  ;;  %v1885_v21 = vrot.slane %v1866_v36, 4 }
 0x194   : > { %v1702_v44 = vsel %vm182_vm0, 0.0, %v1701_v28  ;;  %v1907_v30 = vrot.slane %v3809_v60, 4  ;;  %v1758_v25 = vsel %vm182_vm0, 0.0, %v1757_v39  ;;  %v1703_v59 = vrot.slane %v1688_v5, 4 }
 0x195   : > { %v2558_v0 = vpack.i.bf16 %v1758_v25, %v1702_v44  ;;  %v1285_v28 = vsel %vm182_vm0, 0.0, %v1284_v15  ;;  %v1341_v9 = vsel %vm182_vm0, 0.0, %v1340_v50  ;;  %v2573_v17 = vpack.i.bf16 %v1552_v47, %v3787_v53 }
 0x196   : > { %v1908_v12 = vsel %vm182_vm0, 0.0, %v1907_v30  ;;  %v1759_v20 = vrot.slane %v1744_v16, 4  ;;  %v2568_v39 = vpack.i.bf16 %v1341_v9, %v1285_v28  ;;  %v3842_v27 = vsel %vm182_vm0, 0.0, %v1703_v59 }
 0x197   : > { %1972 = vrot.lane.b32.xlu2 %v1908_v12, %s2738_s6  ;;  %2559 = vrot.lane.b32.xlu0 %v2558_v0, %s2738_s6  ;;  %v1473_v36 = vrot.slane %v3615_v2, 4  ;;  %v1529_v44 = vrot.slane %v3622_v19, 4  ;;  %v4300_v30 = vrot.slane %v3712_v11, 4  ;;  %v4301_v53 = vrot.slane %v3702_v41, 4 }
 0x198   : > { %v3847_v5 = vsel %vm182_vm0, 0.0, %v1759_v20  ;;  %v4302_v16 = vrot.slane %v3632_v29, 4  ;;  %2569 = vrot.lane.b32.xlu1 %v2568_v39, %s2738_s6  ;;  %v4303_v47 = vrot.slane %v3637_v33, 4 }
 0x199   : > { %v1263_v25 = vsel %vm182_vm0, %v1255_v7, %v4300_v30  ;;  %v1319_v0 = vsel %vm182_vm0, %v3754_v3, %v4301_v53  ;;  %v2578_v20 = vpack.i.bf16 %v3847_v5, %v3842_v27  ;;  %v1474_v2 = vsel %vm182_vm0, %v3565_v40, %v1473_v36 }
 0x19a   : > { %v1690_v59 = vsel %vm182_vm0, %v4302_v16, %v3780_v43  ;;  %v1530_v19 = vsel %vm182_vm0, %v3562_v54, %v1529_v44  ;;  %v3868_v41 = vperm.slane %v1263_v25, %v2873_v31  ;;  %v3871_v11 = vperm.slane %v1474_v2, %v2873_v31 }
 0x19b   : > { %v3874_v3 = vperm.slane %v1530_v19, %v2873_v31  ;;  %v3877_v7 = vperm.slane %v1319_v0, %v2873_v31  ;;  %v3880_v27 = vperm.slane %v1690_v59, %v2873_v31  ;;  %v1272_v40 = vrot.slane %v3830_v23, 4 }
 0x19c   : > { %v1886_v54 = vsel %vm182_vm0, %v3715_v18, %v1885_v21  ;;  %v1746_v15 = vsel %vm182_vm0, %v4303_v47, %v3760_v51  ;;  %v1286_v50 = vrot.slane %v3868_v41, 4  ;;  %v1328_v18 = vrot.slane %v3824_v6, 4 }
 0x19d   : > { %v2588_v12 = vpack.i.bf16 %v3874_v3, %v3871_v11  ;;  %v2583_v28 = vpack.i.bf16 %v3877_v7, %v3868_v41  ;;  %v3895_v9 = vperm.slane %v1746_v15, %v2873_v31  ;;  %v1342_v39 = vrot.slane %v3877_v7, 4 }
 0x19e   : > { %v4304_v21 = vrot.slane %v3745_v48, 4  ;;  %v3903_v44 = vsel %vm182_vm0, 0.0, %v1286_v50  ;;  %v1705_v5 = vrot.slane %v3880_v27, 4  ;;  %v1497_v0 = vrot.slane %v3871_v11, 4 }
 0x19f   : > { %2574 = vrot.lane.b32.xlu2 %v2573_v17, %s2738_s6  ;;  %v2593_v30 = vpack.i.bf16 %v3895_v9, %v3880_v27  ;;  %v3910_v25 = vsel %vm182_vm0, 0.0, %v1342_v39  ;;  %v1761_v53 = vrot.slane %v3895_v9, 4  ;;  %v3916_v16 = vperm.slane %v1886_v54, %v2873_v31 }
 0x1a0   : > { %v1964_v36 = vsel %vm182_vm0, 0.0, %v4304_v21  ;;  %v2598_v59 = vpack.i.bf16 %v3910_v25, %v3903_v44  ;;  %v3921_v17 = vsel %vm182_vm0, 0.0, %v1705_v5  ;;  %v1553_v2 = vrot.slane %v3874_v3, 4 }
 0x1a1   : > { %2000 = vrot.lane.b32.xlu0 %v1964_v36, %s2738_s6  ;;  %v4305_v19 = vrot.slane %v3705_v58, 4  ;;  %v3929_v11 = vsel %vm182_vm0, 0.0, %v1761_v53  ;;  %v3932_v15 = vsel %vm182_vm0, 0.0, %v1497_v0  ;;  %v1273_v54 = vsel %vm182_vm0, %v1272_v40, %v3718_v57  ;;  %1976 = vrot.lane.b32.xlu1 %v3916_v16, %s2736_s4 }
 0x1a2   : > { %v2608_v3 = vpack.i.bf16 %v3929_v11, %v3921_v17  ;;  %v3941_v58 = vsel %vm182_vm0, 0.0, %v1553_v2  ;;  %v1329_v50 = vsel %vm182_vm0, %v1328_v18, %v3694_v26  ;;  %v1505_v39 = vrot.slane %v3456_v34, 4 }
 0x1a3   : > { %v1942_v47 = vsel %vm182_vm0, %v3672_v45, %v4305_v19  ;;  %v3944_v45 = vperm.slane %v1273_v54, %v2873_v31  ;;  %v1449_v21 = vrot.slane %v3453_v8, 4  ;;  %v2603_v40 = vpack.i.bf16 %v3941_v58, %v3932_v15 }
 0x1a4   : > { %v3953_v36 = vperm.slane %v1329_v50, %v2873_v31  ;;  %v4306_v5 = vrot.slane %v3780_v43, 4  ;;  %v4307_v0 = vrot.slane %v3760_v51, 4  ;;  %v4308_v8 = vrot.slane %v3708_v62, 4 }
 0x1a5   : > { %v1288_v34 = vrot.slane %v3944_v45, 4  ;;  %v1950_v19 = vperm.slane %v1942_v47, %v2873_v31  ;;  %v1483_v54 = vrot.slane %v3605_v38, 4  ;;  %v1330_v47 = vrot.slane %v3694_v26, 4 }
 0x1a6   : > { %v1692_v53 = vsel %vm182_vm0, %v3632_v29, %v4306_v5  ;;  %v1748_v18 = vsel %vm182_vm0, %v3637_v33, %v4307_v0  ;;  %v3968_v2 = vsel %vm182_vm0, %v3690_v35, %v4308_v8  ;;  %v1539_v33 = vrot.slane %v3590_v52, 4 }
 0x1a7   : > { %v3974_v29 = vperm.slane %v1692_v53, %v2873_v31  ;;  %v3977_v51 = vperm.slane %v1748_v18, %v2873_v31  ;;  %v3982_v62 = vsel %vm182_vm0, 0.0, %v1288_v34  ;;  %v1344_v35 = vrot.slane %v3953_v36, 4  ;;  %2004 = vrot.lane.b32.xlu2 %v1950_v19, %s2736_s4 }
 0x1a8   : > { %v1274_v0 = vrot.slane %v3718_v57, 4  ;;  %v1450_v18 = vsel %vm182_vm0, %v3116_v4, %v1449_v21  ;;  %v1506_v34 = vsel %vm182_vm0, %v3119_v49, %v1505_v39  ;;  %v1909_v7 = vrot.slane %v3916_v16, 4 }
 0x1a9   : > { %v1707_v5 = vrot.slane %v3974_v29, 4  ;;  %v1763_v53 = vrot.slane %v3977_v51, 4  ;;  %2579 = vrot.lane.b32.xlu0 %v2578_v20, %s2737_s5  ;;  %v3998_v26 = vsel %vm182_vm0, 0.0, %v1344_v35  ;;  %v1458_v8 = vperm.slane %v1450_v18, %v2842_v10  ;;  %2589 = vrot.lane.b32.xlu1 %v2588_v12, %s2736_s4 }
 0x1aa   : > { %v1514_v50 = vperm.slane %v1506_v34, %v2842_v10  ;;  %v2628_v43 = vpack.i.bf16 %v3998_v26, %v3982_v62  ;;  %v1275_v49 = vsel %vm182_vm0, %v3830_v23, %v1274_v0  ;;  %v1331_v20 = vsel %vm182_vm0, %v3824_v6, %v1330_v47 }
 0x1ab   : > { %v4005_v57 = vsel %vm182_vm0, 0.0, %v1707_v5  ;;  %v4009_v4 = vsel %vm182_vm0, 0.0, %v1763_v53  ;;  %v1484_v39 = vsel %vm182_vm0, %v1483_v54, %v1458_v8  ;;  %v4020_v5 = vperm.slane %v1275_v49, %v2873_v31 }
 0x1ac   : > { %v1540_v21 = vsel %vm182_vm0, %v1539_v33, %v1514_v50  ;;  %v2638_v35 = vpack.i.bf16 %v4009_v4, %v4005_v57  ;;  %v1490_v12 = vperm.slane %v1484_v39, %v2873_v31  ;;  %v4025_v18 = vperm.slane %v1331_v20, %v2873_v31 }
 0x1ad   : > { %v1546_v53 = vperm.slane %v1540_v21, %v2873_v31  ;;  %v1873_v23 = vrot.slane %v3602_v1, 4  ;;  %v1965_v6 = vrot.slane %v1950_v19, 4  ;;  %v1290_v54 = vrot.slane %v4020_v5, 4 }
 0x1ae   : > { %v2643_v33 = vpack.i.bf16 %v4025_v18, %v4020_v5  ;;  %v1346_v0 = vrot.slane %v4025_v18, 4  ;;  %v1861_v34 = vrot.slane %v3770_v42, 4  ;;  %v1499_v1 = vrot.slane %v1490_v12, 4 }
 0x1af   : > { %v2618_v47 = vpack.i.bf16 %v1546_v53, %v1490_v12  ;;  %2594 = vrot.lane.b32.xlu2 %v2593_v30, %s2735_s30  ;;  %v4038_v49 = vsel %vm182_vm0, 0.0, %v1290_v54  ;;  %v1555_v19 = vrot.slane %v1546_v53, 4  ;;  %v1874_v42 = vsel %vm182_vm0, %v3441_v32, %v1873_v23 }
 0x1b0   : > { %v1347_v20 = vsel %vm182_vm0, 0.0, %v1346_v0  ;;  %v1966_v39 = vsel %vm182_vm0, 0.0, %v1965_v6  ;;  %v1500_v9 = vsel %vm182_vm0, 0.0, %v1499_v1  ;;  %v1862_v41 = vsel %vm182_vm0, %v3541_v22, %v1861_v34 }
 0x1b1   : > { %2584 = vrot.lane.b32.xlu0 %v2583_v28, %s2736_s4  ;;  %v2653_v27 = vpack.i.bf16 %v1347_v20, %v4038_v49  ;;  %2008 = vrot.lane.b32.xlu1 %v1966_v39, %s2737_s5  ;;  %v1556_v30 = vsel %vm182_vm0, 0.0, %v1555_v19  ;;  %v1882_v21 = vperm.slane %v1874_v42, %v2842_v10  ;;  %v1870_v32 = vperm.slane %v1862_v41, %v2842_v10 }
 0x1b2   : > { %v2633_v28 = vpack.i.bf16 %v1556_v30, %v1500_v9  ;;  %v1910_v5 = vsel %vm182_vm0, 0.0, %v1909_v7  ;;  %v4309_v10 = vpack.i.bf16 %v3953_v36, %v3944_v45  ;;  %v1485_v44 = vrot.slane %v1458_v8, 4 }
 0x1b3   : > { %v1895_v12 = vrot.slane %v1882_v21, 4  ;;  %v1541_v25 = vrot.slane %v1514_v50, 4  ;;  %v1958_v15 = vperm.slane %v3727_v46, %v2873_v31  ;;  %v4310_v46 = vpack.i.bf16 %v3977_v51, %v3974_v29 }
 0x1b4   : > { %v1897_v23 = vrot.slane %v1870_v32, 4  ;;  %v1962_v54 = vperm.slane %v3968_v2, %v2873_v31 }
 0x1b5   : > { %v1896_v22 = vsel %vm182_vm0, %v1895_v12, %v1870_v32  ;;  %v1542_v17 = vsel %vm182_vm0, %v3590_v52, %v1541_v25  ;;  %v1967_v52 = vrot.slane %v1958_v15, 4 }
 0x1b6   : > { %v1902_v16 = vperm.slane %v1896_v22, %v2873_v31  ;;  %v1550_v53 = vperm.slane %v1542_v17, %v2873_v31  ;;  %v1898_v6 = vsel %vm182_vm0, %v1882_v21, %v1897_v23  ;;  %v1969_v4 = vrot.slane %v1962_v54, 4 }
 0x1b7   : > { %2599 = vrot.lane.b32.xlu2 %v2598_v59, %s2737_s5  ;;  %v1486_v59 = vsel %vm182_vm0, %v3605_v38, %v1485_v44  ;;  %v1968_v18 = vsel %vm182_vm0, 0.0, %v1967_v52  ;;  %v1906_v29 = vperm.slane %v1898_v6, %v2873_v31 }
 0x1b8   : > { %v1911_v11 = vrot.slane %v1902_v16, 4  ;;  %v1970_v62 = vsel %vm182_vm0, 0.0, %v1969_v4 }
 0x1b9   : > { %1980 = vrot.lane.b32.xlu0 %v1910_v5, %s2737_s5  ;;  %2609 = vrot.lane.b32.xlu1 %v2608_v3, %s2741_s9  ;;  %v1494_v3 = vperm.slane %v1486_v59, %v2873_v31  ;;  %v1913_v51 = vrot.slane %v1906_v29, 4 }
 0x1ba   : > { %v1912_v38 = vsel %vm182_vm0, 0.0, %v1911_v11 }
 0x1bb   : > { %v2648_v58 = vpack.i.bf16 %v1550_v53, %v1494_v3  ;;  %v1501_v45 = vrot.slane %v1494_v3, 4  ;;  %v1914_v57 = vsel %vm182_vm0, 0.0, %v1913_v51 }
 0x1bd   : > { %v1502_v36 = vsel %vm182_vm0, 0.0, %v1501_v45 }
 0x1bf   : > { %1984 = vrot.lane.b32.xlu2 %v1902_v16, %s2735_s30 }
 0x1c1   : > { %2604 = vrot.lane.b32.xlu0 %v2603_v40, %s2737_s5  ;;  %2614 = vrot.lane.b32.xlu1 %v4309_v10, %s2735_s30  ;;  %v1557_v40 = vrot.slane %v1550_v53, 4  ;;  %s2155_s5 = sshll.u32 %s2151_s29, 4  ;;  %s2156_s5 = int_to_ptr.hbm [resolvable:$true] %s2155_s5 }
 0x1c2   : > { %s2682_s6 = sshra.s32 %s2156_s5, 4  ;;  %s2683_s6 = int_to_ptr.hbm [resolvable:$true] %s2682_s6 }
 0x1c3   : > { %v1558_v50 = vsel %vm182_vm0, 0.0, %v1557_v40  ;;  %p2689_p0 = scmp.lt.s32.totalorder %s2683_s6, %s4285_s3 }
 0x1c4   : > { %v2658_v8 = vpack.i.bf16 %v1558_v50, %v1502_v36 }
 0x1c7   : > { %2619 = vrot.lane.b32.xlu2 %v2618_v47, %s2735_s30 }
 0x1c9   : > { %2012 = vrot.lane.b32.xlu0 %v1958_v15, %s2735_s30  ;;  %1988 = vrot.lane.b32.xlu1 %v1912_v38, %s2741_s9  ;;  %s163_s30 = scalar_lea.vmem [#allocation2], %s2219_s25 }
 0x1ca   : > { %s2153_s4 = sshll.u32 %s163_s30, 4  ;;  %s2154_s4 = int_to_ptr.vmem [resolvable:$true] %s2153_s4 }
 0x1cf   : > { %2016 = vrot.lane.b32.xlu2 %v1968_v18, %s2741_s9 }
 0x1d1   : > { %2624 = vrot.lane.b32.xlu0 %v4310_v46, %s2739_s7  ;;  %2634 = vrot.lane.b32.xlu1 %v2633_v28, %s2741_s9 }
 0x1d7   : > { %2639 = vrot.lane.b32.xlu2 %v2638_v35, %s2740_s8 }
 0x1d9   : > { %2629 = vrot.lane.b32.xlu0 %v2628_v43, %s2741_s9  ;;  %2020 = vrot.lane.b32.xlu1 %v1962_v54, %s2739_s7 }
 0x1df   : > { %2644 = vrot.lane.b32.xlu2 %v2643_v33, %s2739_s7 }
 0x1e1   : > { %1992 = vrot.lane.b32.xlu0 %v1906_v29, %s2739_s7  ;;  %1996 = vrot.lane.b32.xlu1 %v1914_v57, %s2740_s8 }
 0x1e7   : > { %2024 = vrot.lane.b32.xlu2 %v1970_v62, %s2740_s8 }
 0x1e9   : > { %2649 = vrot.lane.b32.xlu0 %v2648_v58, %s2739_s7  ;;  %2659 = vrot.lane.b32.xlu1 %v2658_v8, %s2740_s8  ;;  %s2684_s7 = scalar_lea.hbm %s2683_s6, 16 }
 0x1ea   : > { %p2685_p11 = scmp.ne.s32.totalorder %s2683_s6, %s2684_s7  ;;  %p2690_p1 = scmp.lt.s32.totalorder %s2688_s10, %s2684_s7 }
 0x1ec   : > { %p2686_p12 = pnand %p2685_p11, %p2802_p5  ;;  %p2691_p2 = por %p2690_p1, %p2689_p0 }
 0x1ee   : > { %p2687_p13 = pneg %p2686_p12 }
 0x1f0   : > { %p2692_p3 = pnand %p2691_p2, %p2687_p13 }
 0x1f1   : > { %2654 = vrot.lane.b32.xlu0 %v2653_v27, %s2740_s8  ;;  %v4121_v31 = vpop.permute.xlu2 %1972 }
 0x1f9   : > { %v4123_v2 = vpop.permute.xlu2 %2574 }
 0x201   : > { %v2005_v43 = vpop.permute.xlu2 %2004 }
 0x202   : > { %v2565_v26 = vpop.permute.xlu1 %2564 }
 0x203   : > { %v2567_v34 = vunpack.i.h.bf16 %v2565_v26  ;;  %v2566_v49 = vunpack.i.l.bf16 %v2565_v26 }
 0x209   : > { %v2595_v35 = vpop.permute.xlu2 %2594  ;;  %v2560_v47 = vpop.permute.xlu0 %2559 }
 0x20a   : > { %v2562_v33 = vunpack.i.h.bf16 %v2560_v47  ;;  %v2561_v0 = vunpack.i.l.bf16 %v2560_v47  ;;  %v2570_v1 = vpop.permute.xlu1 %2569  ;;  %v2597_v32 = vunpack.i.h.bf16 %v2595_v35  ;;  %v2596_v5 = vunpack.i.l.bf16 %v2595_v35 }
 0x20b   : > { %v2572_v10 = vunpack.i.h.bf16 %v2570_v1  ;;  %v2571_v44 = vunpack.i.l.bf16 %v2570_v1  ;;  %v2075_v1 = vld [vmem:[%s4283_s1] sm:$0xff] }
 0x20c   : > { %v1828_v19 = vsel %vm350_vm3, %v3803_v13, %v2562_v33  ;;  %v1821_v20 = vsel %vm350_vm3, %v3791_v56, %v2561_v0  ;;  %v2027_v0 = vsel %vm350_vm3, %v3809_v60, %v4121_v31  ;;  %v2577_v60 = vunpack.i.h.bf16 %v4123_v2 }
 0x20d   : > { %v1822_v42 = vsel %vm352_vm4, %v1821_v20, %v2566_v49  ;;  %v1829_v39 = vsel %vm352_vm4, %v1828_v19, %v2567_v34  ;;  %v1411_v11 = vsel %vm350_vm3, %v3821_v14, %v2572_v10  ;;  %v1404_v3 = vsel %vm350_vm3, %v3818_v63, %v2571_v44 }
 0x20e   : > { %v2743_v20 = vmov 0   ;;  %v2576_v31 = vunpack.i.l.bf16 %v4123_v2  ;;  %v1622_v2 = vsel %vm350_vm3, %v3734_v61, %v2577_v60 }
 0x20f   : > { %2663 = vset.pattern.permute.xlu2 %v2743_v20  ;;  %2664 = vset.pattern.permute.xlu0 %v2743_v20 }
 0x210   : > { %2078 = vperm.xlu2 %2663, %v2075_v1  }
 0x211   : > { %v2600_v27 = vpop.permute.xlu2 %2599 }
 0x212   : > { %v2602_v53 = vunpack.i.h.bf16 %v2600_v27  ;;  %v2601_v15 = vunpack.i.l.bf16 %v2600_v27 }
 0x213   : > { %v2001_v9 = vpop.permute.xlu0 %2000  ;;  %v1977_v30 = vpop.permute.xlu1 %1976 }
 0x214   : > { %v2034_v51 = vsel %vm350_vm3, %v3745_v48, %v2001_v9  ;;  %v2028_v49 = vsel %vm352_vm4, %v2027_v0, %v1977_v30 }
 0x215   : > { %v2035_v4 = vsel %vm352_vm4, %v2034_v51, %v2005_v43 }
 0x219   : > { %v1985_v21 = vpop.permute.xlu2 %1984 }
 0x21b   : > { %v2580_v41 = vpop.permute.xlu0 %2579  ;;  %v4131_v12 = vpop.permute.xlu1 %2589 }
 0x21c   : > { %v2582_v7 = vunpack.i.h.bf16 %v2580_v41  ;;  %v2581_v28 = vunpack.i.l.bf16 %v2580_v41 }
 0x21e   : > { %v1830_v13 = vsel %vm354_vm5, %v1829_v39, %v2582_v7  ;;  %v1823_v22 = vsel %vm354_vm5, %v1822_v42, %v2581_v28  ;;  %v2592_v42 = vunpack.i.h.bf16 %v4131_v12  ;;  %v2591_v39 = vunpack.i.l.bf16 %v4131_v12 }
 0x21f   : > { %v4136_v56 = vsel %vm356_vm6, %v1823_v22, %v2596_v5  ;;  %v4139_v16 = vsel %vm356_vm6, %v1830_v13, %v2597_v32  ;;  %v1615_v12 = vsel %vm350_vm3, %v3723_v24, %v2576_v31 }
 0x221   : > { %v4147_v38 = vpop.permute.xlu2 %2619 }
 0x223   : > { %v2585_v25 = vpop.permute.xlu0 %2584  ;;  %v2009_v58 = vpop.permute.xlu1 %2008 }
 0x224   : > { %v2587_v59 = vunpack.i.h.bf16 %v2585_v25  ;;  %v2586_v17 = vunpack.i.l.bf16 %v2585_v25  ;;  %v2036_v62 = vsel %vm354_vm5, %v2035_v4, %v2009_v58  ;;  %v1616_v25 = vsel %vm352_vm4, %v1615_v12, %v2591_v39 }
 0x226   : > { %v1405_v45 = vsel %vm352_vm4, %v1404_v3, %v2586_v17  ;;  %v1412_v40 = vsel %vm352_vm4, %v1411_v11, %v2587_v59  ;;  %v2622_v59 = vunpack.i.h.bf16 %v4147_v38  ;;  %v2621_v17 = vunpack.i.l.bf16 %v4147_v38 }
 0x227   : > { %v4150_v52 = vsel %vm354_vm5, %v1405_v45, %v2601_v15  ;;  %v4153_v36 = vsel %vm354_vm5, %v1412_v40, %v2602_v53 }
 0x229   : > { %v2017_v8 = vpop.permute.xlu2 %2016 }
 0x22b   : > { %v1981_v50 = vpop.permute.xlu0 %1980  ;;  %v2610_v14 = vpop.permute.xlu1 %2609 }
 0x22c   : > { %v2029_v19 = vsel %vm354_vm5, %v2028_v49, %v1981_v50  ;;  %v2612_v27 = vunpack.i.h.bf16 %v2610_v14  ;;  %v2611_v41 = vunpack.i.l.bf16 %v2610_v14 }
 0x22d   : > { %v2030_v9 = vsel %vm356_vm6, %v2029_v19, %v1985_v21  ;;  %v1623_v21 = vsel %vm352_vm4, %v1622_v2, %v2592_v42  ;;  %v4314_v2 = vld [vmem:[#allocation6_spill] sm:$0xff] }
 0x22e   : > { %v1832_v11 = vsel %vm358_vm7, %v4139_v16, %v2612_v27  ;;  %v1825_v61 = vsel %vm358_vm7, %v4136_v56, %v2611_v41 }
 0x231   : > { %v4157_v46 = vpop.permute.xlu2 %2639 }
 0x232   : > { %v2642_v40 = vunpack.i.h.bf16 %v4157_v46  ;;  %v2641_v38 = vunpack.i.l.bf16 %v4157_v46 }
 0x233   : > { %v2605_v18 = vpop.permute.xlu0 %2604  ;;  %v4155_v63 = vpop.permute.xlu1 %2614 }
 0x234   : > { %v2607_v7 = vunpack.i.h.bf16 %v2605_v18  ;;  %v2606_v28 = vunpack.i.l.bf16 %v2605_v18 }
 0x236   : > { %v1617_v24 = vsel %vm354_vm5, %v1616_v25, %v2606_v28  ;;  %v1624_v3 = vsel %vm354_vm5, %v1623_v21, %v2607_v7 }
 0x237   : > { %v1618_v16 = vsel %vm356_vm6, %v1617_v24, %v2621_v17  ;;  %v1625_v56 = vsel %vm356_vm6, %v1624_v3, %v2622_v59 }
 0x239   : > { %v4159_v29 = vpop.permute.xlu2 %2644 }
 0x23a   : > { %v2647_v31 = vunpack.i.h.bf16 %v4159_v29  ;;  %v2646_v42 = vunpack.i.l.bf16 %v4159_v29 }
 0x23b   : > { %v2013_v23 = vpop.permute.xlu0 %2012  ;;  %v1989_v6 = vpop.permute.xlu1 %1988 }
 0x23c   : > { %v2037_v26 = vsel %vm356_vm6, %v2036_v62, %v2013_v23  ;;  %v2031_v32 = vsel %vm358_vm7, %v2030_v9, %v1989_v6  ;;  %v2617_v6 = vunpack.i.h.bf16 %v4155_v63 }
 0x23d   : > { %v2038_v47 = vsel %vm358_vm7, %v2037_v26, %v2017_v8 }
 0x23e   : > { %v1414_v1 = vsel %vm356_vm6, %v4153_v36, %v2617_v6 }
 0x241   : > { %v2025_v34 = vpop.permute.xlu2 %2024 }
 0x243   : > { %v2625_v54 = vpop.permute.xlu0 %2624  ;;  %v4163_v57 = vpop.permute.xlu1 %2634 }
 0x244   : > { %v2627_v5 = vunpack.i.h.bf16 %v2625_v54  ;;  %v2626_v13 = vunpack.i.l.bf16 %v2625_v54  ;;  %v2637_v58 = vunpack.i.h.bf16 %v4163_v57  ;;  %v2636_v45 = vunpack.i.l.bf16 %v4163_v57 }
 0x245   : > { %v2616_v54 = vunpack.i.l.bf16 %v4155_v63 }
 0x246   : > { %v1826_v53 = vsel %vm360_vm8, %v1825_v61, %v2626_v13  ;;  %v1833_v15 = vsel %vm360_vm8, %v1832_v11, %v2627_v5  ;;  %v1619_v51 = vsel %vm358_vm7, %v1618_v16, %v2636_v45  ;;  %v1626_v57 = vsel %vm358_vm7, %v1625_v56, %v2637_v58  ;;  %v4311_v5 = vld [vmem:[#allocation7_spill] sm:$0xff]  ;;  %v4312_v13 = vld [vmem:[#allocation8_spill] sm:$0xff] }
 0x247   : > { %v1827_v18 = vsel %vm362_vm9, %v1826_v53, %v2641_v38  ;;  %v1834_v23 = vsel %vm362_vm9, %v1833_v15, %v2642_v40 }
 0x248   : > { %v2061_v0 = vrot.slane %v1827_v18, 4 }
 0x24b   : > { %v4168_v35 = vpop.permute.xlu0 %2629  ;;  %v2021_v33 = vpop.permute.xlu1 %2020 }
 0x24c   : > { %v2039_v48 = vsel %vm360_vm8, %v2038_v47, %v2021_v33  ;;  %v2632_v4 = vunpack.i.h.bf16 %v4168_v35  ;;  %v2631_v62 = vunpack.i.l.bf16 %v4168_v35 }
 0x24d   : > { %v2040_v43 = vsel %vm362_vm9, %v2039_v48, %v2025_v34  ;;  %v2062_v48 = vrot.slane %v1834_v23, 4 }
 0x24e   : > { %2223 = vmatpush.msk.msra.mxu1 %vm2065_vm10, %v2040_v43  ;;  %v1407_v43 = vsel %vm356_vm6, %v4150_v52, %v2616_v54  ;;  %v1415_v60 = vsel %vm358_vm7, %v1414_v1, %v2632_v4 }
 0x24f   : > { %v1408_v20 = vsel %vm358_vm7, %v1407_v43, %v2631_v62  ;;  %v1416_v36 = vsel %vm360_vm8, %v1415_v60, %v2647_v31 }
 0x250   : > { %v1409_v9 = vsel %vm360_vm8, %v1408_v20, %v2646_v42 }
 0x253   : > { %v1993_v30 = vpop.permute.xlu0 %1992  ;;  %v1997_v10 = vpop.permute.xlu1 %1996 }
 0x254   : > { %v2032_v22 = vsel %vm360_vm8, %v2031_v32, %v1993_v30 }
 0x255   : > { %v2033_v44 = vsel %vm362_vm9, %v2032_v22, %v1997_v10  ;;  %v2074_v22 = vld [vmem:[%s4282_s0] sm:$0xff] }
 0x256   : > { %2221 = vmatpush.msk.msra.mxu0 %vm2065_vm10, %v2033_v44  ;;  %v4313_v10 = vld [vmem:[#allocation5_spill] sm:$0xff] }
 0x25b   : > { %v2650_v50 = vpop.permute.xlu0 %2649  ;;  %v2660_v46 = vpop.permute.xlu1 %2659 }
 0x25c   : > { %v2652_v14 = vunpack.i.h.bf16 %v2650_v50  ;;  %v2651_v8 = vunpack.i.l.bf16 %v2650_v50  ;;  %v2662_v26 = vunpack.i.h.bf16 %v2660_v46  ;;  %v2661_v47 = vunpack.i.l.bf16 %v2660_v46 }
 0x25e   : > { %v1620_v33 = vsel %vm360_vm8, %v1619_v51, %v2651_v8  ;;  %v1627_v34 = vsel %vm360_vm8, %v1626_v57, %v2652_v14 }
 0x25f   : > { %v1621_v49 = vsel %vm362_vm9, %v1620_v33, %v2661_v47  ;;  %v1628_v63 = vsel %vm362_vm9, %v1627_v34, %v2662_v26 }
 0x260   : > { %v2072_v35 = vsel %vm2065_vm10, %v1621_v49, %v2061_v0  ;;  %v2073_v19 = vsel %vm2065_vm10, %v1628_v63, %v2062_v48 }
 0x261   : > { %2103 = vmatpush.msra.mxu0 %v2072_v35  ;;  %2123 = vmatpush.msra.mxu1 %v2073_v19 }
 0x263   : > { %v2655_v39 = vpop.permute.xlu0 %2654 }
 0x264   : > { %v2657_v27 = vunpack.i.h.bf16 %v2655_v39  ;;  %v2656_v52 = vunpack.i.l.bf16 %v2655_v39 }
 0x266   : > { %v1410_v30 = vsel %vm362_vm9, %v1409_v9, %v2656_v52  ;;  %v1417_v41 = vsel %vm362_vm9, %v1416_v36, %v2657_v27 }
 0x267   : > { %v2055_v7 = vrot.slane %v1410_v30, 4  ;;  %v2056_v28 = vrot.slane %v1417_v41, 4 }
 0x269   : > { %v2070_v32 = vsel %vm2065_vm10, %v3675_v55, %v2055_v7  ;;  %v2071_v29 = vsel %vm2065_vm10, %v3682_v37, %v2056_v28 }
 0x26a   : > { %2104 = vmatpush.msra.mxu0 %v2070_v32  ;;  %2124 = vmatpush.msra.mxu1 %v2071_v29  ;;  %v2079_v55 = vpop.permute.xlu2 %2078 }
 0x26c   : > { %2105 = vmatpush.msra.mxu0 %v4311_v5  ;;  %2125 = vmatpush.msra.mxu1 %v4312_v13 }
 0x26e   : > { %2106 = vmatpush.msra.mxu0 %v4313_v10  ;;  %2126 = vmatpush.msra.mxu1 %v4314_v2 }
 0x26f   : > { %2222 = vmatmul.msk.f32.vlgmr.msra.gmra.mxu0 %vm2081_vm11, %v2074_v22  ;;  %2224 = vmatmul.msk.f32.vlgmr.msra.gmra.mxu1 %vm2081_vm11, %v2074_v22 }
 0x2ec   : > { %v2108_v37 = vpop.f32.mrf.mxu0  ;;  %v2128_v12 = vpop.f32.mrf.mxu1 }
 0x2ed   : > { %v2109_v44 = vadd.f32 %v2108_v37, %v2079_v55  ;;  %v2129_v21 = vadd.f32 %v2128_v12, %v2079_v55 }
 0x2ef   : > { %vm2131_vm12 = vcmp.ge.f32.partialorder %v2109_v44, 0.0  ;;  %v2133_v25 = vmul.f32 0.2, %v2109_v44  ;;  %vm2132_vm13 = vcmp.ge.f32.partialorder %v2129_v21, 0.0  ;;  %v2134_v59 = vmul.f32 0.2, %v2129_v21 }
 0x2f1   : > { %v2135_v17 = vsel %vm2131_vm12, %v2109_v44, %v2133_v25  ;;  %v2136_v11 = vsel %vm2132_vm13, %v2129_v21, %v2134_v59 }
 0x2f2   : > { %2137 = vst [vmem:[%s163_s30] sm:$0xff] %v2135_v17 }
 0x2f3   : > { %2138 = vst [vmem:[%s163_s30 + $0x8] sm:$0xff] %v2136_v11 }
 0x2f4   : > { %2695 = shalt.err (!%p2692_p3)
}
 0x2f5   : > { %2232 = dma.vmem_to_hbm [thread:$0]  (%p2802_p5), %s2154_s4, 256, %s2156_s5, %s2140_s16  }
 0x2f6 PF: > { %p2238_p4 = scmp.ge.s32.totalorder %s2730_s15, 2  ;;  %s2167_s19 = sand.u32 1, %s2718_s12  }
 0x2f7   : > { %s2168_s20 = scalar_lea.sflag [#allocation3], %s2167_s19 }
 0x2f8   : > { %p2235_p7 = pnand %p2238_p4, %p2806_p6 }
 0x2fa   : > { %p2236_p8 = pneg %p2235_p7 }
 0x2fc   : > { %2713 = dma.done.wait (%p2236_p8), %s2168_s20, 256  }
 0x2fd   : > { %2715 = vsyncadd (%p2236_p8), %s2168_s20, 4294967040  ;;  %p13_p9 = scmp.ge.s32.totalorder %s2789_s18, 4   ;;  %s4315_s12 = smov %s2722_s13 }
 0x2fe   : > { %s4316_s13 = smov %s2726_s14  ;;  %s4317_s14 = smov %s2800_s21 }
 0x2ff   : > { %s4318_s15 = smov %s2789_s18  ;;  %15 = sbr.rel (!%p13_p9) target bundleno = 3 (0x3), region = 67 }
 0x304   :  { %2174 = vsyncpa [#allocation3], 1 }
 0x305   :  { %2176 = vsyncpa [#allocation3 + $0x1], 1 }

</bundles_post_ra>
